<compile_context>
chip_gen: v7x
topology: tpu7x:2x2x1
jax: 0.10.0
libtpu: 0.0.40
codegen_flags: <defaults>
</compile_context>

<pallas_src>
import jax
import jax.numpy as jnp
from jax.experimental import pallas as pl
from jax.experimental.pallas import tpu as pltpu

LANE = 128                             # lane-dense padded output width (>= num_classes)
_MAX_BLOCK_BYTES = 16 * 1024 * 1024    # cap per streamed feature buffer (double-buffered)


def head_kernel(feat_ref, w_ref, b_ref, out_ref):
    """Fused token mean-pool + Linear(768 -> 10) head.

    feat_ref : (TB, L, C)  input dtype  VMEM  token features (one batch tile)
    w_ref    : (C, LANE)   f32          VMEM  (digit1.weight.T / L), zero-padded to 128 lanes
    b_ref    : (1, LANE)   f32          VMEM  digit1.bias zero-padded to 128 lanes
    out_ref  : (TB, LANE)  f32          VMEM  logits (cols >= num_classes hold only bias pad)
    """
    # Token sum with f32 accumulation, WITHOUT materializing an f32 copy of the
    # whole (TB, L, C) block (keeps VMEM footprint == the streamed tile itself).
    pooled_sum = jnp.sum(feat_ref[...], axis=1, dtype=jnp.float32)      # (TB, C)
    # The 1/L mean scale is pre-folded into w_ref, so the body is just dot + bias.
    out_ref[...] = (
        jnp.dot(pooled_sum, w_ref[...], preferred_element_type=jnp.float32)
        + b_ref[...]
    )


def prepare_head_params(w, b, seq_len):
    """One-time prep (model-load time): PyTorch digit1.weight (10, 768) / bias (10,)
    -> lane-dense (768, 128) transposed weight with the 1/seq_len mean scale folded
    in, and (1, 128) bias, both zero-padded.

    NOTE: seq_len (token count; 49 for swin_tiny @ 224) is baked into the weight.
    Re-run this prep if the input resolution / token count changes."""
    num_classes, c = w.shape
    w_t = jnp.zeros((c, LANE), jnp.float32).at[:, :num_classes].set(
        (jnp.transpose(w).astype(jnp.float32)) / jnp.float32(seq_len))
    b_p = jnp.zeros((1, LANE), jnp.float32).at[:, :num_classes].set(
        b.astype(jnp.float32))
    return w_t, b_p


def model_head(features, w_t_padded, b_padded, *, num_classes=10):
    """features: (B, L, C) token features (any float dtype, streamed as-is);
    w_t_padded: (C, 128) f32 with 1/L folded in; b_padded: (1, 128) f32.
    Returns (B, num_classes) f32 logits."""
    B, L, C = features.shape
    itemsize = jnp.dtype(features.dtype).itemsize

    # --- batch tiling: tile-count first, minimal padding -----------------------
    rows8 = pl.cdiv(B, 8)                         # batch in 8-row (sublane) groups
    # Sublane padding of the token dim inside each VMEM block (8 f32 / 16 bf16).
    sub = {4: 8, 2: 16, 1: 32}.get(itemsize, 8)
    row_bytes = (sub * pl.cdiv(L, sub)) * C * itemsize
    max_rows = max(8, 8 * ((_MAX_BLOCK_BYTES // row_bytes) // 8))

    n_tiles = max(
        pl.cdiv(8 * rows8, max_rows),   # VMEM cap on the streamed (double-buffered) block
        pl.cdiv(B, 256),                # keep tiles <= ~256 rows (big enough for HBM roofline)
        min(2, rows8),                  # >= 2 grid steps when B > 8 so v7x uses both TCs
    )
    tb = 8 * pl.cdiv(rows8, n_tiles)    # minimal batch padding for that tile count
    n_tiles = pl.cdiv(B, tb)
    b_pad = tb * n_tiles
    if b_pad != B:
        # Single pass; no standalone dtype cast (stream features in native dtype).
        features = jnp.pad(features, ((0, b_pad - B), (0, 0), (0, 0)))

    out_padded = pl.pallas_call(
        head_kernel,
        out_shape=jax.ShapeDtypeStruct((b_pad, LANE), jnp.float32),
        grid=(n_tiles,),
        in_specs=[
            pl.BlockSpec((tb, L, C), lambda i: (i, 0, 0)),   # streamed batch tiles
            pl.BlockSpec((C, LANE), lambda i: (0, 0)),       # weight: fetched once, resident
            pl.BlockSpec((1, LANE), lambda i: (0, 0)),       # bias: fetched once, resident
        ],
        out_specs=pl.BlockSpec((tb, LANE), lambda i: (i, 0)),
        compiler_params=pltpu.CompilerParams(
            # Independent batch tiles -> shard grid steps across both v7x TCs;
            # plain serial loop on v5e/v6e.
            dimension_semantics=("parallel",),
            # 2 x <=16 MiB feature buffers + resident weight/bias + output tiles
            # stays well under 48 MiB; leaves headroom inside v7x's 64 MiB VMEM
            # and is comfortably within v5e/v6e's 128 MiB.
            vmem_limit_bytes=48 * 1024 * 1024,
        ),
    )(features, w_t_padded, b_padded)

    # Drop the batch padding and the lane padding (cols >= num_classes).
    return out_padded[:B, :num_classes]


if __name__ == "__main__":
    # swin_tiny forward_features on 224x224 yields (B, 49, 768) tokens.
    B, L, C, NUM_CLASSES = 2, 49, 768, 10

    key = jax.random.PRNGKey(0)
    k_feat, k_w, k_b = jax.random.split(key, 3)

    # Stand-in for the backbone output (see TODO above). Streamed as f32.
    features = jax.random.normal(k_feat, (B, L, C), dtype=jnp.float32)

    # Deterministic init of digit1 = nn.Linear(768, 10)
    # (PyTorch default: U(-1/sqrt(in_features), 1/sqrt(in_features))).
    bound = 1.0 / jnp.sqrt(jnp.float32(C))
    w = jax.random.uniform(k_w, (NUM_CLASSES, C), jnp.float32, -bound, bound)
    b = jax.random.uniform(k_b, (NUM_CLASSES,), jnp.float32, -bound, bound)

    # One-time weight prep (model-load time): transpose, pad, fold in 1/L.
    w_t_padded, b_padded = prepare_head_params(w, b, seq_len=L)

    out = jax.block_until_ready(
        model_head(features, w_t_padded, b_padded, num_classes=NUM_CLASSES))

    # Pure-JAX f32 reference of the module's head math.
    pooled = features.mean(axis=1)
    ref = jnp.dot(pooled, jnp.transpose(w),
                  precision=jax.lax.Precision.HIGHEST) + b

    assert out.shape == (B, NUM_CLASSES)
    max_err = float(jnp.max(jnp.abs(out - ref)))
    assert jnp.allclose(out, ref, atol=1e-3, rtol=1e-3), max_err

    print("KERNEL_OK")
</pallas_src>

<mosaic_0001>
module attributes {stable_mosaic.version = 11 : i64} {
  func.func @head_kernel(%arg0: i32, %arg1: memref<8x49x768xf32, #tpu.memory_space<vmem>>, %arg2: memref<768x128xf32, #tpu.memory_space<vmem>>, %arg3: memref<1x128xf32, #tpu.memory_space<vmem>>, %arg4: memref<8x128xf32, #tpu.memory_space<vmem>>) attributes {dimension_semantics = [#tpu.dimension_semantics<parallel>], iteration_bounds = array<i64: 1>, scalar_prefetch = 0 : i64, scratch_operands = 0 : i64, tpu.core_type = #tpu.core_type<tc>, window_params = [{transform_indices = @transform_0, window_bounds = array<i64: 8, 49, 768>}, {pipeline_mode = #tpu.pipeline_mode<synchronous>, transform_indices = @transform_1, window_bounds = array<i64: 768, 128>}, {pipeline_mode = #tpu.pipeline_mode<synchronous>, transform_indices = @transform_2, window_bounds = array<i64: 1, 128>}, {transform_indices = @transform_3, window_bounds = array<i64: 8, 128>}]} {
    %c0 = arith.constant 0 : index
    %c0_0 = arith.constant 0 : index
    %c0_1 = arith.constant 0 : index
    %0 = vector.load %arg1[%c0, %c0_0, %c0_1] : memref<8x49x768xf32, #tpu.memory_space<vmem>>, vector<8x49x768xf32>
    %cst = arith.constant dense<0.000000e+00> : vector<8x768xf32>
    %1 = vector.multi_reduction <add>, %0, %cst [1] : vector<8x49x768xf32> to vector<8x768xf32>
    %c0_2 = arith.constant 0 : index
    %c0_3 = arith.constant 0 : index
    %2 = vector.load %arg2[%c0_2, %c0_3] : memref<768x128xf32, #tpu.memory_space<vmem>>, vector<768x128xf32>
    %cst_4 = arith.constant dense<0.000000e+00> : vector<8x128xf32>
    %3 = tpu.matmul %1, %2, %cst_4 {dimension_numbers = #tpu.dot_dimension_numbers<[1], [0], [0], [1], [0, 0, 1, 1], [], []>} : vector<8x768xf32>, vector<768x128xf32>, vector<8x128xf32> -> vector<8x128xf32>
    %c0_5 = arith.constant 0 : index
    %c0_6 = arith.constant 0 : index
    %4 = vector.load %arg3[%c0_5, %c0_6] : memref<1x128xf32, #tpu.memory_space<vmem>>, vector<1x128xf32>
    %5 = vector.broadcast %4 : vector<1x128xf32> to vector<8x128xf32>
    %6 = arith.addf %3, %5 : vector<8x128xf32>
    %c0_7 = arith.constant 0 : index
    %c0_8 = arith.constant 0 : index
    %7 = vector.load %arg4[%c0_7, %c0_8] : memref<8x128xf32, #tpu.memory_space<vmem>>, vector<8x128xf32>
    tpu.vector_store %arg4[%c0_7, %c0_8], %6 {strides = array<i32>} : memref<8x128xf32, #tpu.memory_space<vmem>>, vector<8x128xf32>,
    return
  }
  func.func @transform_0(%arg0: i32) -> (i32, i32, i32) {
    %c0_i32 = arith.constant 0 : i32
    %c0_i32_0 = arith.constant 0 : i32
    %c0_i32_1 = arith.constant 0 : i32
    return %arg0, %c0_i32, %c0_i32_0 : i32, i32, i32
  }
  func.func @transform_1(%arg0: i32) -> (i32, i32) {
    %c0_i32 = arith.constant 0 : i32
    %c0_i32_0 = arith.constant 0 : i32
    %c0_i32_1 = arith.constant 0 : i32
    return %c0_i32, %c0_i32_0 : i32, i32
  }
  func.func @transform_2(%arg0: i32) -> (i32, i32) {
    %c0_i32 = arith.constant 0 : i32
    %c0_i32_0 = arith.constant 0 : i32
    %c0_i32_1 = arith.constant 0 : i32
    return %c0_i32, %c0_i32_0 : i32, i32
  }
  func.func @transform_3(%arg0: i32) -> (i32, i32) {
    %c0_i32 = arith.constant 0 : i32
    %c0_i32_0 = arith.constant 0 : i32
    return %arg0, %c0_i32 : i32, i32
  }
}

</mosaic_0001>

<bundles_post_ra>
// kernel: tpu_custom_call.1
= control target key start
LH: loop header
LB: loop body
LE: loop exit
PB: predicated region body
PF: predicated region fallthrough
CT: control target
= control target key end

     0   :  { %vm356_vm0 = vcmask 1040384   ;;  %vm1127_vm1 = vcmask 1041409   ;;  %vm1129_vm2 = vcmask 1042434   ;;  %vm1131_vm3 = vcmask 1043459   ;;  %s3176_s0 = inlined_call_operand.vmem [shape: f32[8,49,768], index: 0, kind: input, shape index: {}]   ;;  %s3177_s1 = inlined_call_operand.vmem [shape: f32[768,128], index: 1, kind: input, shape index: {}]   ;;  %s3178_s2 = inlined_call_operand.vmem [shape: f32[1,128], index: 2, kind: input, shape index: {}]   ;;  %s3179_s3 = inlined_call_operand.hbm [shape: f32[8,128], index: 3, kind: output, shape index: {}]  }
   0x1   :  { %v992_v0 = vld [vmem:[%s3177_s1 + $0x80] sm:$0xff]  ;;  %v993_v1 = vld [vmem:[%s3177_s1 + $0x88] sm:$0xff]  ;;  %v994_v11 = vld [vmem:[%s3177_s1 + $0x90] sm:$0xff]  ;;  %vm1133_vm4 = vcmask 1044484   ;;  %vm1135_vm5 = vcmask 1045509   ;;  %vm1137_vm6 = vcmask 1046534  }
   0x2   :  { %v976_v2 = vld [vmem:[%s3177_s1] sm:$0xff]  ;;  %v1513_v3 = vpack.c.bf16 %v993_v1, %v992_v0  ;;  %v977_v4 = vld [vmem:[%s3177_s1 + $0x8] sm:$0xff]  ;;  %v995_v13 = vld [vmem:[%s3177_s1 + $0x98] sm:$0xff]  ;;  %vm1139_vm7 = vcmask 1047559  }
   0x3   :  { %v1024_v5 = vld [vmem:[%s3177_s1 + $0x180] sm:$0xff]  ;;  %v1025_v6 = vld [vmem:[%s3177_s1 + $0x188] sm:$0xff]  ;;  %v1515_v7 = vpack.c.bf16 %v977_v4, %v976_v2  ;;  %v978_v14 = vld [vmem:[%s3177_s1 + $0x10] sm:$0xff]  ;;  %v1517_v16 = vpack.c.bf16 %v995_v13, %v994_v11 }
   0x4   :  { %v1545_v8 = vpack.c.bf16 %v1025_v6, %v1024_v5  ;;  %v1008_v9 = vld [vmem:[%s3177_s1 + $0x100] sm:$0xff]  ;;  %v1009_v10 = vld [vmem:[%s3177_s1 + $0x108] sm:$0xff]  ;;  %1514 = vmatprep.subr.bf16.mxu0 %v1513_v3  ;;  %v979_v15 = vld [vmem:[%s3177_s1 + $0x18] sm:$0xff] }
   0x5   :  { %v1547_v12 = vpack.c.bf16 %v1009_v10, %v1008_v9  ;;  %1516 = vmatpush3.bf16.msra.mxu0 %v1515_v7  ;;  %v1519_v17 = vpack.c.bf16 %v979_v15, %v978_v14  ;;  %v1026_v18 = vld [vmem:[%s3177_s1 + $0x190] sm:$0xff]  ;;  %v1027_v19 = vld [vmem:[%s3177_s1 + $0x198] sm:$0xff]  ;;  %v996_v23 = vld [vmem:[%s3177_s1 + $0xa0] sm:$0xff] }
   0x6   :  { %1546 = vmatprep.subr.bf16.mxu1 %v1545_v8  ;;  %v1010_v20 = vld [vmem:[%s3177_s1 + $0x110] sm:$0xff]  ;;  %v1549_v21 = vpack.c.bf16 %v1027_v19, %v1026_v18  ;;  %v1011_v22 = vld [vmem:[%s3177_s1 + $0x118] sm:$0xff]  ;;  %v997_v24 = vld [vmem:[%s3177_s1 + $0xa8] sm:$0xff]  ;;  %1518 = vmatprep.subr.bf16.mxu0 %v1517_v16 }
   0x7   :  { %1548 = vmatpush3.bf16.msra.mxu1 %v1547_v12  ;;  %v1551_v25 = vpack.c.bf16 %v1011_v22, %v1010_v20  ;;  %v1521_v26 = vpack.c.bf16 %v997_v24, %v996_v23  ;;  %v980_v27 = vld [vmem:[%s3177_s1 + $0x20] sm:$0xff]  ;;  %v981_v28 = vld [vmem:[%s3177_s1 + $0x28] sm:$0xff]  ;;  %v998_v35 = vld [vmem:[%s3177_s1 + $0xb0] sm:$0xff] }
   0x8   :  { %v1028_v29 = vld [vmem:[%s3177_s1 + $0x1a0] sm:$0xff]  ;;  %1550 = vmatprep.subr.bf16.mxu1 %v1549_v21  ;;  %v1029_v30 = vld [vmem:[%s3177_s1 + $0x1a8] sm:$0xff]  ;;  %v1523_v33 = vpack.c.bf16 %v981_v28, %v980_v27  ;;  %v999_v36 = vld [vmem:[%s3177_s1 + $0xb8] sm:$0xff] }
   0x9   :  { %v1012_v31 = vld [vmem:[%s3177_s1 + $0x120] sm:$0xff]  ;;  %v1013_v32 = vld [vmem:[%s3177_s1 + $0x128] sm:$0xff]  ;;  %1520 = vmatpush3.bf16.msra.mxu0 %v1519_v17  ;;  %v1553_v34 = vpack.c.bf16 %v1029_v30, %v1028_v29  ;;  %v982_v37 = vld [vmem:[%s3177_s1 + $0x30] sm:$0xff]  ;;  %v1525_v39 = vpack.c.bf16 %v999_v36, %v998_v35 }
   0xa   :  { %1522 = vmatprep.subr.bf16.mxu0 %v1521_v26  ;;  %v1555_v38 = vpack.c.bf16 %v1013_v32, %v1012_v31  ;;  %v983_v40 = vld [vmem:[%s3177_s1 + $0x38] sm:$0xff]  ;;  %v1030_v41 = vld [vmem:[%s3177_s1 + $0x1b0] sm:$0xff]  ;;  %v1000_v46 = vld [vmem:[%s3177_s1 + $0xc0] sm:$0xff] }
   0xb   :  { %1552 = vmatpush3.bf16.msra.mxu1 %v1551_v25  ;;  %v1031_v42 = vld [vmem:[%s3177_s1 + $0x1b8] sm:$0xff]  ;;  %v1014_v44 = vld [vmem:[%s3177_s1 + $0x130] sm:$0xff]  ;;  %v1001_v47 = vld [vmem:[%s3177_s1 + $0xc8] sm:$0xff]  ;;  %v1527_v48 = vpack.c.bf16 %v983_v40, %v982_v37 }
   0xc   :  { %1554 = vmatprep.subr.bf16.mxu1 %v1553_v34  ;;  %v1557_v43 = vpack.c.bf16 %v1031_v42, %v1030_v41  ;;  %v1015_v45 = vld [vmem:[%s3177_s1 + $0x138] sm:$0xff]  ;;  %v1032_v49 = vld [vmem:[%s3177_s1 + $0x1c0] sm:$0xff]  ;;  %v1033_v50 = vld [vmem:[%s3177_s1 + $0x1c8] sm:$0xff]  ;;  %v1529_v52 = vpack.c.bf16 %v1001_v47, %v1000_v46 }
   0xd   :  { %1524 = vmatpush3.bf16.msra.mxu0 %v1523_v33  ;;  %v1559_v51 = vpack.c.bf16 %v1015_v45, %v1014_v44  ;;  %v984_v53 = vld [vmem:[%s3177_s1 + $0x40] sm:$0xff]  ;;  %v985_v54 = vld [vmem:[%s3177_s1 + $0x48] sm:$0xff]  ;;  %v1561_v56 = vpack.c.bf16 %v1033_v50, %v1032_v49  ;;  %v1002_v58 = vld [vmem:[%s3177_s1 + $0xd0] sm:$0xff] }
   0xe   :  { %1526 = vmatprep.subr.bf16.mxu0 %v1525_v39  ;;  %v1016_v55 = vld [vmem:[%s3177_s1 + $0x140] sm:$0xff]  ;;  %v1017_v57 = vld [vmem:[%s3177_s1 + $0x148] sm:$0xff]  ;;  %v1003_v59 = vld [vmem:[%s3177_s1 + $0xd8] sm:$0xff]  ;;  %v1531_v62 = vpack.c.bf16 %v985_v54, %v984_v53 }
   0xf   :  { %1556 = vmatpush3.bf16.msra.mxu1 %v1555_v38  ;;  %v1034_v60 = vld [vmem:[%s3177_s1 + $0x1d0] sm:$0xff]  ;;  %v1035_v61 = vld [vmem:[%s3177_s1 + $0x1d8] sm:$0xff]  ;;  %v1563_v63 = vpack.c.bf16 %v1017_v57, %v1016_v55  ;;  %v1533_v0 = vpack.c.bf16 %v1003_v59, %v1002_v58  ;;  %v1004_v6 = vld [vmem:[%s3177_s1 + $0xe0] sm:$0xff] }
  0x10   :  { %1558 = vmatprep.subr.bf16.mxu1 %v1557_v43  ;;  %v986_v1 = vld [vmem:[%s3177_s1 + $0x50] sm:$0xff]  ;;  %v987_v2 = vld [vmem:[%s3177_s1 + $0x58] sm:$0xff]  ;;  %v1565_v4 = vpack.c.bf16 %v1035_v61, %v1034_v60  ;;  %v1005_v7 = vld [vmem:[%s3177_s1 + $0xe8] sm:$0xff] }
  0x11   :  { %1528 = vmatpush3.bf16.msra.mxu0 %v1527_v48  ;;  %v1018_v3 = vld [vmem:[%s3177_s1 + $0x150] sm:$0xff]  ;;  %v1019_v5 = vld [vmem:[%s3177_s1 + $0x158] sm:$0xff]  ;;  %v988_v8 = vld [vmem:[%s3177_s1 + $0x60] sm:$0xff]  ;;  %v1535_v12 = vpack.c.bf16 %v987_v2, %v986_v1  ;;  %v1537_v18 = vpack.c.bf16 %v1005_v7, %v1004_v6 }
  0x12   :  { %1530 = vmatprep.subr.bf16.mxu0 %v1529_v52  ;;  %v989_v9 = vld [vmem:[%s3177_s1 + $0x68] sm:$0xff]  ;;  %v1036_v10 = vld [vmem:[%s3177_s1 + $0x1e0] sm:$0xff]  ;;  %v1006_v15 = vld [vmem:[%s3177_s1 + $0xf0] sm:$0xff]  ;;  %v1567_v17 = vpack.c.bf16 %v1019_v5, %v1018_v3 }
  0x13   :  { %1560 = vmatpush3.bf16.msra.mxu1 %v1559_v51  ;;  %v1037_v11 = vld [vmem:[%s3177_s1 + $0x1e8] sm:$0xff]  ;;  %v1020_v13 = vld [vmem:[%s3177_s1 + $0x160] sm:$0xff]  ;;  %v1007_v19 = vld [vmem:[%s3177_s1 + $0xf8] sm:$0xff]  ;;  %v1539_v30 = vpack.c.bf16 %v989_v9, %v988_v8 }
  0x14   :  { %1562 = vmatprep.subr.bf16.mxu1 %v1561_v56  ;;  %v1021_v14 = vld [vmem:[%s3177_s1 + $0x168] sm:$0xff]  ;;  %v22_v20 = vld [vmem:[%s3176_s0 + $0x38] sm:$0xff]  ;;  %v1569_v22 = vpack.c.bf16 %v1037_v11, %v1036_v10  ;;  %v1038_v23 = vld [vmem:[%s3177_s1 + $0x1f0] sm:$0xff]  ;;  %v1541_v37 = vpack.c.bf16 %v1007_v19, %v1006_v15 }
  0x15   :  { %1532 = vmatpush3.bf16.msra.mxu0 %v1531_v62  ;;  %v16_v16 = vld [vmem:[%s3176_s0 + $0x8] sm:$0xff]  ;;  %v1039_v24 = vld [vmem:[%s3177_s1 + $0x1f8] sm:$0xff]  ;;  %v990_v31 = vld [vmem:[%s3177_s1 + $0x70] sm:$0xff]  ;;  %v1571_v36 = vpack.c.bf16 %v1021_v14, %v1020_v13 }
  0x16   :  { %1534 = vmatprep.subr.bf16.mxu0 %v1533_v0  ;;  %v28_v21 = vld [vmem:[%s3176_s0 + $0x68] sm:$0xff]  ;;  %v34_v25 = vld [vmem:[%s3176_s0 + $0x98] sm:$0xff]  ;;  %v365_v26 = vadd.f32 %v22_v20, %v16_v16  ;;  %v1573_v42 = vpack.c.bf16 %v1039_v24, %v1038_v23 }
  0x17   :  { %1564 = vmatpush3.bf16.msra.mxu1 %v1563_v63  ;;  %v58_v27 = vld [vmem:[%s3176_s0 + $0x158] sm:$0xff]  ;;  %v64_v28 = vld [vmem:[%s3176_s0 + $0x188] sm:$0xff] }
  0x18   :  { %1566 = vmatprep.subr.bf16.mxu1 %v1565_v4  ;;  %v70_v29 = vld [vmem:[%s3176_s0 + $0x1b8] sm:$0xff]  ;;  %v40_v33 = vld [vmem:[%s3176_s0 + $0xc8] sm:$0xff]  ;;  %v366_v34 = vadd.f32 %v365_v26, %v28_v21  ;;  %v443_v35 = vadd.f32 %v64_v28, %v58_v27 }
  0x19   :  { %1536 = vmatpush3.bf16.msra.mxu0 %v1535_v12  ;;  %v991_v32 = vld [vmem:[%s3177_s1 + $0x78] sm:$0xff]  ;;  %v76_v39 = vld [vmem:[%s3176_s0 + $0x1e8] sm:$0xff] }
  0x1a   :  { %1538 = vmatprep.subr.bf16.mxu0 %v1537_v18  ;;  %v46_v38 = vld [vmem:[%s3176_s0 + $0xf8] sm:$0xff]  ;;  %v100_v40 = vld [vmem:[%s3176_s0 + $0x2a8] sm:$0xff]  ;;  %v367_v46 = vadd.f32 %v366_v34, %v34_v25  ;;  %v444_v47 = vadd.f32 %v443_v35, %v70_v29  ;;  %v1543_v53 = vpack.c.bf16 %v991_v32, %v990_v31 }
  0x1b   :  { %1568 = vmatpush3.bf16.msra.mxu1 %v1567_v17  ;;  %v106_v41 = vld [vmem:[%s3176_s0 + $0x2d8] sm:$0xff]  ;;  %v52_v43 = vld [vmem:[%s3176_s0 + $0x128] sm:$0x1] }
  0x1c   :  { %1570 = vmatprep.subr.bf16.mxu1 %v1569_v22  ;;  %v82_v44 = vld [vmem:[%s3176_s0 + $0x218] sm:$0xff]  ;;  %v112_v45 = vld [vmem:[%s3176_s0 + $0x308] sm:$0xff]  ;;  %v521_v48 = vadd.f32 %v106_v41, %v100_v40  ;;  %v368_v57 = vadd.f32 %v367_v46, %v40_v33  ;;  %v445_v58 = vadd.f32 %v444_v47, %v76_v39  ;;  %v370_v63 = vsel %vm356_vm0, %v52_v43, 0.0 }
  0x1d   :  { %v88_v49 = vld [vmem:[%s3176_s0 + $0x248] sm:$0xff]  ;;  %v94_v50 = vld [vmem:[%s3176_s0 + $0x278] sm:$0x1]  ;;  %1540 = vmatpush3.bf16.msra.mxu0 %v1539_v30 }
  0x1e   :  { %v118_v51 = vld [vmem:[%s3176_s0 + $0x338] sm:$0xff]  ;;  %v124_v54 = vld [vmem:[%s3176_s0 + $0x368] sm:$0xff]  ;;  %v522_v59 = vadd.f32 %v521_v48, %v112_v45  ;;  %1542 = vmatprep.subr.bf16.mxu0 %v1541_v37  ;;  %v369_v4 = vadd.f32 %v368_v57, %v46_v38  ;;  %v446_v5 = vadd.f32 %v445_v58, %v82_v44  ;;  %v448_v10 = vsel %vm356_vm0, %v94_v50, 0.0 }
  0x1f   :  { %v142_v52 = vld [vmem:[%s3176_s0 + $0x3f8] sm:$0xff]  ;;  %v148_v55 = vld [vmem:[%s3176_s0 + $0x428] sm:$0xff]  ;;  %1572 = vmatpush3.bf16.msra.mxu1 %v1571_v36 }
  0x20   :  { %v154_v56 = vld [vmem:[%s3176_s0 + $0x458] sm:$0xff]  ;;  %v136_v60 = vld [vmem:[%s3176_s0 + $0x3c8] sm:$0x1]  ;;  %v599_v0 = vadd.f32 %v148_v55, %v142_v52  ;;  %1574 = vmatprep.subr.bf16.mxu1 %v1573_v42  ;;  %v523_v6 = vadd.f32 %v522_v59, %v118_v51  ;;  %v371_v16 = vadd.f32 %v370_v63, %v369_v4  ;;  %v447_v17 = vadd.f32 %v446_v5, %v88_v49 }
  0x21   :  { %v160_v61 = vld [vmem:[%s3176_s0 + $0x488] sm:$0xff]  ;;  %v178_v62 = vld [vmem:[%s3176_s0 + $0x518] sm:$0x1]  ;;  %1544 = vmatpush3.bf16.msra.mxu0 %v1543_v53  ;;  %v526_v19 = vsel %vm356_vm0, %v136_v60, 0.0 }
  0x22   :  { %v184_v1 = vld [vmem:[%s3176_s0 + $0x548] sm:$0xff]  ;;  %v190_v2 = vld [vmem:[%s3176_s0 + $0x578] sm:$0xff]  ;;  %v600_v11 = vadd.f32 %v599_v0, %v154_v56  ;;  %v524_v18 = vadd.f32 %v523_v6, %v124_v54  ;;  %v604_v24 = vsel %vm356_vm0, %v178_v62, 0.0  ;;  %v372_v30 = vrot.slane %v371_v16, 4 }
  0x23   :  { %v196_v3 = vld [vmem:[%s3176_s0 + $0x5a8] sm:$0xff]  ;;  %v130_v7 = vld [vmem:[%s3176_s0 + $0x398] sm:$0xff]  ;;  %v677_v12 = vadd.f32 %v190_v2, %v184_v1  ;;  %v449_v31 = vadd.f32 %v448_v10, %v447_v17 }
  0x24   :  { %v166_v8 = vld [vmem:[%s3176_s0 + $0x4b8] sm:$0xff]  ;;  %v220_v13 = vld [vmem:[%s3176_s0 + $0x668] sm:$0x1]  ;;  %v601_v23 = vadd.f32 %v600_v11, %v160_v61  ;;  %v525_v32 = vadd.f32 %v524_v18, %v130_v7  ;;  %v373_v43 = vadd.f32 %v372_v30, %v371_v16  ;;  %v1022_v30 = vld [vmem:[%s3177_s1 + $0x170] sm:$0xff] }
  0x25   :  { %v202_v9 = vld [vmem:[%s3176_s0 + $0x5d8] sm:$0xff]  ;;  %v232_v15 = vld [vmem:[%s3176_s0 + $0x6c8] sm:$0xff]  ;;  %v678_v25 = vadd.f32 %v677_v12, %v196_v3  ;;  %v682_v33 = vsel %vm356_vm0, %v220_v13, 0.0  ;;  %v450_v44 = vrot.slane %v449_v31, 4 }
  0x26   :  { %v226_v14 = vld [vmem:[%s3176_s0 + $0x698] sm:$0xff]  ;;  %v172_v20 = vld [vmem:[%s3176_s0 + $0x4e8] sm:$0xff]  ;;  %v602_v36 = vadd.f32 %v601_v23, %v166_v8  ;;  %v527_v45 = vadd.f32 %v526_v19, %v525_v32  ;;  %v374_v56 = vrot.slane %v373_v43, 2 }
  0x27   :  { %v208_v21 = vld [vmem:[%s3176_s0 + $0x608] sm:$0xff]  ;;  %v238_v22 = vld [vmem:[%s3176_s0 + $0x6f8] sm:$0xff]  ;;  %v755_v26 = vadd.f32 %v232_v15, %v226_v14  ;;  %v679_v37 = vadd.f32 %v678_v25, %v202_v9  ;;  %v451_v57 = vadd.f32 %v450_v44, %v449_v31 }
  0x28   :  { %v244_v27 = vld [vmem:[%s3176_s0 + $0x728] sm:$0xff]  ;;  %v262_v28 = vld [vmem:[%s3176_s0 + $0x7b8] sm:$0x1]  ;;  %v603_v50 = vadd.f32 %v602_v36, %v172_v20  ;;  %v528_v58 = vrot.slane %v527_v45, 4  ;;  %v375_v2 = vadd.f32 %v374_v56, %v373_v43 }
  0x29   :  { %v268_v29 = vld [vmem:[%s3176_s0 + $0x7e8] sm:$0xff]  ;;  %v274_v34 = vld [vmem:[%s3176_s0 + $0x818] sm:$0xff]  ;;  %v756_v38 = vadd.f32 %v755_v26, %v238_v22  ;;  %v760_v39 = vsel %vm356_vm0, %v262_v28, 0.0  ;;  %v680_v51 = vadd.f32 %v679_v37, %v208_v21  ;;  %v452_v3 = vrot.slane %v451_v57, 2 }
  0x2a   :  { %v280_v35 = vld [vmem:[%s3176_s0 + $0x848] sm:$0xff]  ;;  %v214_v40 = vld [vmem:[%s3176_s0 + $0x638] sm:$0xff]  ;;  %v833_v46 = vadd.f32 %v274_v34, %v268_v29  ;;  %v605_v61 = vadd.f32 %v604_v24, %v603_v50  ;;  %v529_v4 = vadd.f32 %v528_v58, %v527_v45  ;;  %v376_v12 = vrot.slane %v375_v2, 1 }
  0x2b   :  { %v250_v41 = vld [vmem:[%s3176_s0 + $0x758] sm:$0xff]  ;;  %v304_v42 = vld [vmem:[%s3176_s0 + $0x908] sm:$0x1]  ;;  %v757_v52 = vadd.f32 %v756_v38, %v244_v27  ;;  %v681_v62 = vadd.f32 %v680_v51, %v214_v40  ;;  %v453_v13 = vadd.f32 %v452_v3, %v451_v57  ;;  %v15_v40 = vld [vmem:[%s3176_s0] sm:$0xff] }
  0x2c   :  { %v286_v47 = vld [vmem:[%s3176_s0 + $0x878] sm:$0xff]  ;;  %v316_v49 = vld [vmem:[%s3176_s0 + $0x968] sm:$0xff]  ;;  %v838_v53 = vsel %vm356_vm0, %v304_v42, 0.0  ;;  %v834_v59 = vadd.f32 %v833_v46, %v280_v35  ;;  %v606_v7 = vrot.slane %v605_v61, 4  ;;  %v530_v14 = vrot.slane %v529_v4, 2  ;;  %v33_v57 = vld [vmem:[%s3176_s0 + $0x90] sm:$0xff] }
  0x2d   :  { %v310_v48 = vld [vmem:[%s3176_s0 + $0x938] sm:$0xff]  ;;  %v256_v54 = vld [vmem:[%s3176_s0 + $0x788] sm:$0xff]  ;;  %v758_v63 = vadd.f32 %v757_v52, %v250_v41  ;;  %v683_v8 = vadd.f32 %v682_v33, %v681_v62  ;;  %v377_v22 = vadd.f32 %v376_v12, %v375_v2  ;;  %v454_v23 = vrot.slane %v453_v13, 1  ;;  %v21_v41 = vld [vmem:[%s3176_s0 + $0x30] sm:$0xff] }
  0x2e   :  { %v322_v55 = vld [vmem:[%s3176_s0 + $0x998] sm:$0xff]  ;;  %v292_v60 = vld [vmem:[%s3176_s0 + $0x8a8] sm:$0xff]  ;;  %v911_v0 = vadd.f32 %v316_v49, %v310_v48  ;;  %v835_v5 = vadd.f32 %v834_v59, %v286_v47  ;;  %v607_v17 = vadd.f32 %v606_v7, %v605_v61  ;;  %v531_v24 = vadd.f32 %v530_v14, %v529_v4  ;;  %v51_v42 = vld [vmem:[%s3176_s0 + $0x120] sm:$0x1] }
  0x2f   :  { %v328_v1 = vld [vmem:[%s3176_s0 + $0x9c8] sm:$0xff]  ;;  %v298_v6 = vld [vmem:[%s3176_s0 + $0x8d8] sm:$0xff]  ;;  %v759_v9 = vadd.f32 %v758_v63, %v256_v54  ;;  %v684_v18 = vrot.slane %v683_v8, 4  ;;  %v455_v32 = vadd.f32 %v454_v23, %v453_v13  ;;  %v27_v47 = vld [vmem:[%s3176_s0 + $0x60] sm:$0xff]  ;;  %v351_v58 = vadd.f32 %v21_v41, %v15_v40 }
  0x30   :  { %v912_v10 = vadd.f32 %v911_v0, %v322_v55  ;;  %v334_v11 = vld [vmem:[%s3176_s0 + $0x9f8] sm:$0xff]  ;;  %v836_v15 = vadd.f32 %v835_v5, %v292_v60  ;;  %v340_v21 = vld [vmem:[%s3176_s0 + $0xa28] sm:$0xff]  ;;  %v608_v26 = vrot.slane %v607_v17, 2  ;;  %v532_v33 = vrot.slane %v531_v24, 1  ;;  %v57_v52 = vld [vmem:[%s3176_s0 + $0x150] sm:$0xff] }
  0x31   :  { %v346_v16 = vld [vmem:[%s3176_s0 + $0xa58] sm:$0x1]  ;;  %v761_v19 = vadd.f32 %v760_v39, %v759_v9  ;;  %v685_v27 = vadd.f32 %v684_v18, %v683_v8  ;;  %v1141_v45 = vsel %vm1127_vm1, %v455_v32, %v377_v22  ;;  %v93_v54 = vld [vmem:[%s3176_s0 + $0x270] sm:$0x1]  ;;  %v2050_v59 = vsel %vm356_vm0, %v51_v42, 0.0  ;;  %v39_v4 = vld [vmem:[%s3176_s0 + $0xc0] sm:$0xff] }
  0x32   :  { %v913_v20 = vadd.f32 %v912_v10, %v328_v1  ;;  %v837_v25 = vadd.f32 %v836_v15, %v298_v6  ;;  %v1023_v31 = vld [vmem:[%s3177_s1 + $0x178] sm:$0xff]  ;;  %v916_v35 = vsel %vm356_vm0, %v346_v16, 0.0  ;;  %v609_v36 = vadd.f32 %v608_v26, %v607_v17  ;;  %v69_v0 = vld [vmem:[%s3176_s0 + $0x1b0] sm:$0xff]  ;;  %v99_v1 = vld [vmem:[%s3176_s0 + $0x2a0] sm:$0xff] }
  0x33   :  { %v762_v28 = vrot.slane %v761_v19, 4  ;;  %v686_v37 = vrot.slane %v685_v27, 2  ;;  %v533_v43 = vadd.f32 %v532_v33, %v531_v24  ;;  %v1575_v46 = vpack.c.bf16 %v1023_v31, %v1022_v30  ;;  %v105_v2 = vld [vmem:[%s3176_s0 + $0x2d0] sm:$0xff]  ;;  %v135_v5 = vld [vmem:[%s3176_s0 + $0x3c0] sm:$0x1] }
  0x34   :  { %v914_v29 = vadd.f32 %v913_v20, %v334_v11  ;;  %v839_v34 = vadd.f32 %v838_v53, %v837_v25  ;;  %v610_v48 = vrot.slane %v609_v36, 1  ;;  %v63_v53 = vld [vmem:[%s3176_s0 + $0x180] sm:$0xff]  ;;  %v352_v6 = vadd.f32 %v351_v58, %v27_v47  ;;  %v45_v13 = vld [vmem:[%s3176_s0 + $0xf0] sm:$0xff] }
  0x35   :  { %v763_v38 = vadd.f32 %v762_v28, %v761_v19  ;;  %v687_v49 = vadd.f32 %v686_v37, %v685_v27  ;;  %v1142_v56 = vsel %vm1129_vm2, %v533_v43, %v1141_v45  ;;  %1576 = vmatpush3.bf16.msra.mxu1 %v1575_v46  ;;  %v430_v7 = vadd.f32 %v63_v53, %v57_v52  ;;  %v75_v14 = vld [vmem:[%s3176_s0 + $0x1e0] sm:$0xff]  ;;  %v141_v17 = vld [vmem:[%s3176_s0 + $0x3f0] sm:$0xff] }
  0x36   :  { %v915_v39 = vadd.f32 %v914_v29, %v340_v21  ;;  %v840_v44 = vrot.slane %v839_v34, 4  ;;  %v611_v60 = vadd.f32 %v610_v48, %v609_v36  ;;  %v2068_v8 = vsel %vm356_vm0, %v93_v54, 0.0  ;;  %v111_v15 = vld [vmem:[%s3176_s0 + $0x300] sm:$0xff]  ;;  %v177_v19 = vld [vmem:[%s3176_s0 + $0x510] sm:$0x1] }
  0x37   :  { %v764_v50 = vrot.slane %v763_v38, 2  ;;  %v688_v61 = vrot.slane %v687_v49, 1  ;;  %v147_v18 = vld [vmem:[%s3176_s0 + $0x420] sm:$0xff]  ;;  %v353_v20 = vadd.f32 %v352_v6, %v33_v57  ;;  %v431_v21 = vadd.f32 %v430_v7, %v69_v0  ;;  %v81_v26 = vld [vmem:[%s3176_s0 + $0x210] sm:$0xff] }
  0x38   :  { %v917_v51 = vadd.f32 %v916_v35, %v915_v39  ;;  %v841_v55 = vadd.f32 %v840_v44, %v839_v34  ;;  %v1143_v12 = vsel %vm1131_vm3, %v611_v60, %v1142_v56  ;;  %v508_v22 = vadd.f32 %v105_v2, %v99_v1  ;;  %v117_v27 = vld [vmem:[%s3176_s0 + $0x330] sm:$0xff]  ;;  %v183_v31 = vld [vmem:[%s3176_s0 + $0x540] sm:$0xff] }
  0x39   :  { %v765_v62 = vadd.f32 %v764_v50, %v763_v38  ;;  %v689_v9 = vadd.f32 %v688_v61, %v687_v49  ;;  %v153_v28 = vld [vmem:[%s3176_s0 + $0x450] sm:$0xff]  ;;  %v513_v29 = vsel %vm356_vm0, %v135_v5, 0.0  ;;  %v219_v33 = vld [vmem:[%s3176_s0 + $0x660] sm:$0x1]  ;;  %v354_v34 = vadd.f32 %v353_v20, %v39_v4 }
  0x3a   :  { %v918_v63 = vrot.slane %v917_v51, 4  ;;  %v842_v3 = vrot.slane %v841_v55, 2  ;;  %v189_v32 = vld [vmem:[%s3176_s0 + $0x570] sm:$0xff]  ;;  %v432_v35 = vadd.f32 %v431_v21, %v75_v14  ;;  %v509_v36 = vadd.f32 %v508_v22, %v111_v15  ;;  %v87_v39 = vld [vmem:[%s3176_s0 + $0x240] sm:$0xff] }
  0x3b   :  { %v766_v10 = vrot.slane %v765_v62, 1  ;;  %v1144_v25 = vsel %vm1133_vm4, %v689_v9, %v1143_v12  ;;  %v123_v40 = vld [vmem:[%s3176_s0 + $0x360] sm:$0xff]  ;;  %v586_v42 = vadd.f32 %v147_v18, %v141_v17  ;;  %v591_v43 = vsel %vm356_vm0, %v177_v19, 0.0  ;;  %v225_v46 = vld [vmem:[%s3176_s0 + $0x690] sm:$0xff] }
  0x3c   :  { %v919_v11 = vadd.f32 %v918_v63, %v917_v51  ;;  %v843_v16 = vadd.f32 %v842_v3, %v841_v55  ;;  %v159_v41 = vld [vmem:[%s3176_s0 + $0x480] sm:$0xff]  ;;  %v355_v48 = vadd.f32 %v354_v34, %v45_v13  ;;  %v433_v49 = vadd.f32 %v432_v35, %v81_v26  ;;  %v129_v52 = vld [vmem:[%s3176_s0 + $0x390] sm:$0xff] }
  0x3d   :  { %v767_v23 = vadd.f32 %v766_v10, %v765_v62  ;;  %v195_v45 = vld [vmem:[%s3176_s0 + $0x5a0] sm:$0xff]  ;;  %v510_v50 = vadd.f32 %v509_v36, %v117_v27  ;;  %v261_v53 = vld [vmem:[%s3176_s0 + $0x7b0] sm:$0x1]  ;;  %v587_v54 = vadd.f32 %v586_v42, %v153_v28  ;;  %v664_v55 = vadd.f32 %v189_v32, %v183_v31 }
  0x3e   :  { %v920_v24 = vrot.slane %v919_v11, 2  ;;  %v844_v30 = vrot.slane %v843_v16, 1  ;;  %v231_v47 = vld [vmem:[%s3176_s0 + $0x6c0] sm:$0xff]  ;;  %v669_v56 = vsel %vm356_vm0, %v219_v33, 0.0  ;;  %v165_v58 = vld [vmem:[%s3176_s0 + $0x4b0] sm:$0xff]  ;;  %v358_v62 = vadd.f32 %v2050_v59, %v355_v48 }
  0x3f   :  { %v1145_v38 = vsel %vm1135_vm5, %v767_v23, %v1144_v25  ;;  %v201_v60 = vld [vmem:[%s3176_s0 + $0x5d0] sm:$0xff]  ;;  %v434_v63 = vadd.f32 %v433_v49, %v87_v39  ;;  %v511_v0 = vadd.f32 %v510_v50, %v123_v40  ;;  %v171_v2 = vld [vmem:[%s3176_s0 + $0x4e0] sm:$0xff]  ;;  %v588_v5 = vadd.f32 %v587_v54, %v159_v41 }
  0x40   :  { %v921_v37 = vadd.f32 %v920_v24, %v919_v11  ;;  %v845_v44 = vadd.f32 %v844_v30, %v843_v16  ;;  %v237_v61 = vld [vmem:[%s3176_s0 + $0x6f0] sm:$0xff]  ;;  %v267_v3 = vld [vmem:[%s3176_s0 + $0x7e0] sm:$0xff]  ;;  %v665_v6 = vadd.f32 %v664_v55, %v195_v45  ;;  %v742_v7 = vadd.f32 %v231_v47, %v225_v46 }
  0x41   :  { %v273_v4 = vld [vmem:[%s3176_s0 + $0x810] sm:$0xff]  ;;  %v207_v59 = vld [vmem:[%s3176_s0 + $0x600] sm:$0xff]  ;;  %v359_v11 = vrot.slane %v358_v62, 4  ;;  %v436_v12 = vadd.f32 %v2068_v8, %v434_v63  ;;  %v512_v13 = vadd.f32 %v511_v0, %v129_v52  ;;  %v747_v14 = vsel %vm356_vm0, %v261_v53, 0.0 }
  0x42   :  { %v922_v51 = vrot.slane %v921_v37, 1  ;;  %v1146_v57 = vsel %vm1137_vm6, %v845_v44, %v1145_v38  ;;  %v243_v9 = vld [vmem:[%s3176_s0 + $0x720] sm:$0xff]  ;;  %v213_v16 = vld [vmem:[%s3176_s0 + $0x630] sm:$0xff]  ;;  %v589_v18 = vadd.f32 %v588_v5, %v165_v58  ;;  %v666_v19 = vadd.f32 %v665_v6, %v201_v60 }
  0x43   :  { %v303_v10 = vld [vmem:[%s3176_s0 + $0x900] sm:$0x1]  ;;  %v743_v20 = vadd.f32 %v742_v7, %v237_v61  ;;  %v249_v8 = vld [vmem:[%s3176_s0 + $0x750] sm:$0xff]  ;;  %v360_v23 = vadd.f32 %v359_v11, %v358_v62  ;;  %v437_v24 = vrot.slane %v436_v12, 4  ;;  %v514_v25 = vadd.f32 %v513_v29, %v512_v13 }
  0x44   :  { %v923_v1 = vadd.f32 %v922_v51, %v921_v37  ;;  %v279_v17 = vld [vmem:[%s3176_s0 + $0x840] sm:$0xff]  ;;  %v309_v21 = vld [vmem:[%s3176_s0 + $0x930] sm:$0xff]  ;;  %v820_v26 = vadd.f32 %v273_v4, %v267_v3  ;;  %v590_v28 = vadd.f32 %v589_v18, %v171_v2  ;;  %v667_v30 = vadd.f32 %v666_v19, %v207_v59  ;;  %v18_v19 = vld [vmem:[%s3176_s0 + $0x18] sm:$0xff] }
  0x45   :  { %v315_v22 = vld [vmem:[%s3176_s0 + $0x960] sm:$0xff]  ;;  %v285_v27 = vld [vmem:[%s3176_s0 + $0x870] sm:$0xff]  ;;  %v744_v31 = vadd.f32 %v743_v20, %v243_v9  ;;  %v825_v32 = vsel %vm356_vm0, %v303_v10, 0.0  ;;  %v361_v35 = vrot.slane %v360_v23, 2  ;;  %v438_v29 = vadd.f32 %v437_v24, %v436_v12  ;;  %v1057_v10 = vld [vmem:[%s3177_s1 + $0x288] sm:$0xff] }
  0x46   :  { %v1147_v15 = vsel %vm1139_vm7, %v923_v1, %v1146_v57  ;;  %v255_v33 = vld [vmem:[%s3176_s0 + $0x780] sm:$0xff]  ;;  %v321_v34 = vld [vmem:[%s3176_s0 + $0x990] sm:$0xff]  ;;  %v515_v36 = vrot.slane %v514_v25, 4  ;;  %v821_v37 = vadd.f32 %v820_v26, %v279_v17  ;;  %v592_v39 = vadd.f32 %v591_v43, %v590_v28  ;;  %v24_v20 = vld [vmem:[%s3176_s0 + $0x48] sm:$0xff] }
  0x47   :  { %1246 = vmatprep.mubr.f32.mxu0 %v1147_v15  ;;  %v291_v38 = vld [vmem:[%s3176_s0 + $0x8a0] sm:$0xff]  ;;  %v668_v40 = vadd.f32 %v667_v30, %v213_v16  ;;  %v745_v41 = vadd.f32 %v744_v31, %v249_v8  ;;  %v898_v42 = vadd.f32 %v315_v22, %v309_v21  ;;  %v362_v45 = vadd.f32 %v361_v35, %v360_v23  ;;  %v297_v49 = vld [vmem:[%s3176_s0 + $0x8d0] sm:$0xff]  ;;  %v54_v8 = vld [vmem:[%s3176_s0 + $0x138] sm:$0x1] }
  0x48   :  { %v327_v44 = vld [vmem:[%s3176_s0 + $0x9c0] sm:$0xff]  ;;  %v439_v46 = vrot.slane %v438_v29, 2  ;;  %v516_v47 = vadd.f32 %v515_v36, %v514_v25  ;;  %v822_v48 = vadd.f32 %v821_v37, %v285_v27  ;;  %v593_v50 = vrot.slane %v592_v39, 4  ;;  %v333_v43 = vld [vmem:[%s3176_s0 + $0x9f0] sm:$0xff]  ;;  %v30_v25 = vld [vmem:[%s3176_s0 + $0x78] sm:$0xff] }
  0x49   :  { %v670_v51 = vadd.f32 %v669_v56, %v668_v40  ;;  %v746_v52 = vadd.f32 %v745_v41, %v255_v33  ;;  %v899_v53 = vadd.f32 %v898_v42, %v321_v34  ;;  %v363_v54 = vrot.slane %v362_v45, 1  ;;  %v345_v60 = vld [vmem:[%s3176_s0 + $0xa50] sm:$0x1]  ;;  %v339_v56 = vld [vmem:[%s3176_s0 + $0xa20] sm:$0xff]  ;;  %v60_v31 = vld [vmem:[%s3176_s0 + $0x168] sm:$0xff] }
  0x4a   :  { %v440_v55 = vadd.f32 %v439_v46, %v438_v29  ;;  %v517_v57 = vrot.slane %v516_v47, 2  ;;  %v823_v58 = vadd.f32 %v822_v48, %v291_v38  ;;  %v594_v61 = vadd.f32 %v593_v50, %v592_v39  ;;  %v1056_v9 = vld [vmem:[%s3177_s1 + $0x280] sm:$0xff]  ;;  %v96_v33 = vld [vmem:[%s3176_s0 + $0x288] sm:$0x1]  ;;  %v138_v48 = vld [vmem:[%s3176_s0 + $0x3d8] sm:$0x1] }
  0x4b   :  { %v671_v62 = vrot.slane %v670_v51, 4  ;;  %v748_v63 = vadd.f32 %v747_v14, %v746_v52  ;;  %v900_v0 = vadd.f32 %v899_v53, %v327_v44  ;;  %v364_v1 = vadd.f32 %v363_v54, %v362_v45  ;;  %v36_v29 = vld [vmem:[%s3176_s0 + $0xa8] sm:$0xff]  ;;  %v102_v44 = vld [vmem:[%s3176_s0 + $0x2b8] sm:$0xff] }
  0x4c   :  { %v441_v2 = vrot.slane %v440_v55, 1  ;;  %v518_v3 = vadd.f32 %v517_v57, %v516_v47  ;;  %v824_v4 = vadd.f32 %v823_v58, %v297_v49  ;;  %v595_v5 = vrot.slane %v594_v61, 2  ;;  %v72_v42 = vld [vmem:[%s3176_s0 + $0x1c8] sm:$0xff]  ;;  %v42_v47 = vld [vmem:[%s3176_s0 + $0xd8] sm:$0xff] }
  0x4d   :  { %v672_v6 = vadd.f32 %v671_v62, %v670_v51  ;;  %v749_v7 = vrot.slane %v748_v63, 4  ;;  %v901_v59 = vadd.f32 %v900_v0, %v333_v43  ;;  %v903_v14 = vsel %vm356_vm0, %v345_v60, 0.0  ;;  %v108_v45 = vld [vmem:[%s3176_s0 + $0x2e8] sm:$0xff]  ;;  %v78_v57 = vld [vmem:[%s3176_s0 + $0x1f8] sm:$0xff] }
  0x4e   :  { %v442_v11 = vadd.f32 %v441_v2, %v440_v55  ;;  %v519_v12 = vrot.slane %v518_v3, 1  ;;  %v826_v13 = vadd.f32 %v825_v32, %v824_v4  ;;  %v596_v15 = vadd.f32 %v595_v5, %v594_v61  ;;  %v66_v32 = vld [vmem:[%s3176_s0 + $0x198] sm:$0xff]  ;;  %v48_v55 = vld [vmem:[%s3176_s0 + $0x108] sm:$0xff] }
  0x4f   :  { %v673_v16 = vrot.slane %v672_v6, 2  ;;  %v750_v17 = vadd.f32 %v749_v7, %v748_v63  ;;  %v902_v18 = vadd.f32 %v901_v59, %v339_v56  ;;  %v1577_v24 = vpack.c.bf16 %v1057_v10, %v1056_v9  ;;  %v114_v58 = vld [vmem:[%s3176_s0 + $0x318] sm:$0xff]  ;;  %v144_v61 = vld [vmem:[%s3176_s0 + $0x408] sm:$0xff] }
  0x50   :  { %v520_v21 = vadd.f32 %v519_v12, %v518_v3  ;;  %v827_v22 = vrot.slane %v826_v13, 4  ;;  %v1128_v23 = vsel %vm1127_vm1, %v442_v11, %v364_v1  ;;  %v597_v26 = vrot.slane %v596_v15, 1  ;;  %v150_v62 = vld [vmem:[%s3176_s0 + $0x438] sm:$0xff]  ;;  %v180_v63 = vld [vmem:[%s3176_s0 + $0x528] sm:$0x1] }
  0x51   :  { %v674_v27 = vadd.f32 %v673_v16, %v672_v6  ;;  %v751_v28 = vrot.slane %v750_v17, 2  ;;  %v904_v30 = vadd.f32 %v903_v14, %v902_v18  ;;  %1578 = vmatprep.subr.bf16.mxu0 %v1577_v24  ;;  %v391_v36 = vadd.f32 %v24_v20, %v18_v19  ;;  %v84_v5 = vld [vmem:[%s3176_s0 + $0x228] sm:$0xff]  ;;  %v186_v10 = vld [vmem:[%s3176_s0 + $0x558] sm:$0xff] }
  0x52   :  { %v828_v34 = vadd.f32 %v827_v22, %v826_v13  ;;  %v1130_v35 = vsel %vm1129_vm2, %v520_v21, %v1128_v23  ;;  %v2245_v37 = vsel %vm356_vm0, %v54_v8, 0.0  ;;  %v598_v38 = vadd.f32 %v597_v26, %v596_v15  ;;  %v120_v6 = vld [vmem:[%s3176_s0 + $0x348] sm:$0xff]  ;;  %v222_v12 = vld [vmem:[%s3176_s0 + $0x678] sm:$0x1] }
  0x53   :  { %v675_v39 = vrot.slane %v674_v27, 1  ;;  %v752_v40 = vadd.f32 %v751_v28, %v750_v17  ;;  %v905_v41 = vrot.slane %v904_v30, 4  ;;  %v392_v49 = vadd.f32 %v391_v36, %v30_v25  ;;  %v156_v7 = vld [vmem:[%s3176_s0 + $0x468] sm:$0xff]  ;;  %v90_v18 = vld [vmem:[%s3176_s0 + $0x258] sm:$0xff] }
  0x54   :  { %v829_v46 = vrot.slane %v828_v34, 2  ;;  %v469_v50 = vadd.f32 %v66_v32, %v60_v31  ;;  %v2263_v51 = vsel %vm356_vm0, %v96_v33, 0.0  ;;  %v1132_v54 = vsel %vm1131_vm3, %v598_v38, %v1130_v35  ;;  %v192_v11 = vld [vmem:[%s3176_s0 + $0x588] sm:$0xff]  ;;  %v126_v19 = vld [vmem:[%s3176_s0 + $0x378] sm:$0xff] }
  0x55   :  { %v676_v52 = vadd.f32 %v675_v39, %v674_v27  ;;  %v753_v53 = vrot.slane %v752_v40, 1  ;;  %v906_v43 = vadd.f32 %v905_v41, %v904_v30  ;;  %v393_v0 = vadd.f32 %v392_v49, %v36_v29  ;;  %v162_v20 = vld [vmem:[%s3176_s0 + $0x498] sm:$0xff]  ;;  %v228_v24 = vld [vmem:[%s3176_s0 + $0x6a8] sm:$0xff] }
  0x56   :  { %v830_v60 = vadd.f32 %v829_v46, %v828_v34  ;;  %v470_v56 = vadd.f32 %v469_v50, %v72_v42  ;;  %v547_v1 = vadd.f32 %v108_v45, %v102_v44  ;;  %v552_v59 = vsel %vm356_vm0, %v138_v48, 0.0  ;;  %v198_v23 = vld [vmem:[%s3176_s0 + $0x5b8] sm:$0xff]  ;;  %v132_v31 = vld [vmem:[%s3176_s0 + $0x3a8] sm:$0xff] }
  0x57   :  { %v754_v2 = vadd.f32 %v753_v53, %v752_v40  ;;  %v907_v3 = vrot.slane %v906_v43, 2  ;;  %v1134_v4 = vsel %vm1133_vm4, %v676_v52, %v1132_v54  ;;  %v394_v13 = vadd.f32 %v393_v0, %v42_v47  ;;  %v234_v25 = vld [vmem:[%s3176_s0 + $0x6d8] sm:$0xff]  ;;  %v264_v32 = vld [vmem:[%s3176_s0 + $0x7c8] sm:$0x1] }
  0x58   :  { %v831_v9 = vrot.slane %v830_v60, 1  ;;  %v471_v14 = vadd.f32 %v470_v56, %v78_v57  ;;  %v548_v15 = vadd.f32 %v547_v1, %v114_v58  ;;  %v625_v8 = vadd.f32 %v150_v62, %v144_v61  ;;  %v168_v36 = vld [vmem:[%s3176_s0 + $0x4c8] sm:$0xff]  ;;  %v174_v45 = vld [vmem:[%s3176_s0 + $0x4f8] sm:$0xff] }
  0x59   :  { %v908_v16 = vadd.f32 %v907_v3, %v906_v43  ;;  %v1136_v17 = vsel %vm1135_vm5, %v754_v2, %v1134_v4  ;;  %v630_v21 = vsel %vm356_vm0, %v180_v63, 0.0  ;;  %v395_v26 = vadd.f32 %v394_v13, %v48_v55  ;;  %v204_v38 = vld [vmem:[%s3176_s0 + $0x5e8] sm:$0xff]  ;;  %v270_v46 = vld [vmem:[%s3176_s0 + $0x7f8] sm:$0xff] }
  0x5a   :  { %v832_v22 = vadd.f32 %v831_v9, %v830_v60  ;;  %v472_v27 = vadd.f32 %v471_v14, %v84_v5  ;;  %v549_v28 = vadd.f32 %v548_v15, %v120_v6  ;;  %v626_v33 = vadd.f32 %v625_v8, %v156_v7  ;;  %v240_v39 = vld [vmem:[%s3176_s0 + $0x708] sm:$0xff]  ;;  %v246_v52 = vld [vmem:[%s3176_s0 + $0x738] sm:$0xff] }
  0x5b   :  { %v909_v30 = vrot.slane %v908_v16, 1  ;;  %v703_v34 = vadd.f32 %v192_v11, %v186_v10  ;;  %v708_v35 = vsel %vm356_vm0, %v222_v12, 0.0  ;;  %v397_v40 = vadd.f32 %v2245_v37, %v395_v26  ;;  %v276_v47 = vld [vmem:[%s3176_s0 + $0x828] sm:$0xff]  ;;  %v210_v37 = vld [vmem:[%s3176_s0 + $0x618] sm:$0xff] }
  0x5c   :  { %v1138_v29 = vsel %vm1137_vm6, %v832_v22, %v1136_v17  ;;  %v473_v41 = vadd.f32 %v472_v27, %v90_v18  ;;  %v550_v42 = vadd.f32 %v549_v28, %v126_v19  ;;  %v627_v48 = vadd.f32 %v626_v33, %v162_v20  ;;  %v306_v53 = vld [vmem:[%s3176_s0 + $0x918] sm:$0x1]  ;;  %v216_v60 = vld [vmem:[%s3176_s0 + $0x648] sm:$0xff] }
  0x5d   :  { %v910_v44 = vadd.f32 %v909_v30, %v908_v16  ;;  %v704_v49 = vadd.f32 %v703_v34, %v198_v23  ;;  %v781_v50 = vadd.f32 %v234_v25, %v228_v24  ;;  %v398_v43 = vrot.slane %v397_v40, 4  ;;  %v282_v61 = vld [vmem:[%s3176_s0 + $0x858] sm:$0xff]  ;;  %v312_v56 = vld [vmem:[%s3176_s0 + $0x948] sm:$0xff] }
  0x5e   :  { %v475_v54 = vadd.f32 %v2263_v51, %v473_v41  ;;  %v551_v55 = vadd.f32 %v550_v42, %v132_v31  ;;  %v786_v57 = vsel %vm356_vm0, %v264_v32, 0.0  ;;  %v628_v62 = vadd.f32 %v627_v48, %v168_v36  ;;  %v252_v51 = vld [vmem:[%s3176_s0 + $0x768] sm:$0xff]  ;;  %v318_v1 = vld [vmem:[%s3176_s0 + $0x978] sm:$0xff] }
  0x5f   :  { %v1140_v58 = vsel %vm1139_vm7, %v910_v44, %v1138_v29  ;;  %v705_v63 = vadd.f32 %v704_v49, %v204_v38  ;;  %v782_v0 = vadd.f32 %v781_v50, %v240_v39  ;;  %v399_v2 = vadd.f32 %v398_v43, %v397_v40  ;;  %v288_v6 = vld [vmem:[%s3176_s0 + $0x888] sm:$0xff]  ;;  %v258_v12 = vld [vmem:[%s3176_s0 + $0x798] sm:$0xff] }
  0x60   :  { %1247 = vmatmul.mubr.f32.vlgmr.msra.gmra.mrb[0].mxu0 %v1140_v58  ;;  %v476_v3 = vrot.slane %v475_v54, 4  ;;  %v553_v4 = vadd.f32 %v552_v59, %v551_v55  ;;  %v859_v5 = vadd.f32 %v276_v47, %v270_v46  ;;  %v629_v7 = vadd.f32 %v628_v62, %v174_v45  ;;  %v324_v13 = vld [vmem:[%s3176_s0 + $0x9a8] sm:$0xff]  ;;  %v294_v17 = vld [vmem:[%s3176_s0 + $0x8b8] sm:$0xff] }
  0x61   :  { %v706_v9 = vadd.f32 %v705_v63, %v210_v37  ;;  %v783_v10 = vadd.f32 %v782_v0, %v246_v52  ;;  %v864_v11 = vsel %vm356_vm0, %v306_v53, 0.0  ;;  %v400_v14 = vrot.slane %v399_v2, 2  ;;  %v330_v22 = vld [vmem:[%s3176_s0 + $0x9d8] sm:$0xff]  ;;  %v300_v27 = vld [vmem:[%s3176_s0 + $0x8e8] sm:$0xff]  ;;  %v1040_v52 = vld [vmem:[%s3177_s1 + $0x200] sm:$0xff] }
  0x62   :  { %v477_v59 = vadd.f32 %v476_v3, %v475_v54  ;;  %v554_v15 = vrot.slane %v553_v4, 4  ;;  %v860_v16 = vadd.f32 %v859_v5, %v282_v61  ;;  %v631_v18 = vadd.f32 %v630_v21, %v629_v7  ;;  %v336_v21 = vld [vmem:[%s3176_s0 + $0xa08] sm:$0xff]  ;;  %v17_v63 = vld [vmem:[%s3176_s0 + $0x10] sm:$0xff]  ;;  %v23_v0 = vld [vmem:[%s3176_s0 + $0x40] sm:$0xff] }
  0x63   :  { %v707_v19 = vadd.f32 %v706_v9, %v216_v60  ;;  %v784_v20 = vadd.f32 %v783_v10, %v252_v51  ;;  %v937_v8 = vadd.f32 %v318_v1, %v312_v56  ;;  %v401_v23 = vadd.f32 %v400_v14, %v399_v2  ;;  %v348_v38 = vld [vmem:[%s3176_s0 + $0xa68] sm:$0x1]  ;;  %v53_v51 = vld [vmem:[%s3176_s0 + $0x130] sm:$0x1]  ;;  %v59_v10 = vld [vmem:[%s3176_s0 + $0x160] sm:$0xff] }
  0x64   :  { %v478_v24 = vrot.slane %v477_v59, 2  ;;  %v555_v25 = vadd.f32 %v554_v15, %v553_v4  ;;  %v861_v26 = vadd.f32 %v860_v16, %v288_v6  ;;  %v632_v28 = vrot.slane %v631_v18, 4  ;;  %v1041_v53 = vld [vmem:[%s3177_s1 + $0x208] sm:$0xff]  ;;  %v29_v4 = vld [vmem:[%s3176_s0 + $0x70] sm:$0xff] }
  0x65   :  { %v709_v30 = vadd.f32 %v708_v35, %v707_v19  ;;  %v785_v31 = vadd.f32 %v784_v20, %v258_v12  ;;  %v938_v32 = vadd.f32 %v937_v8, %v324_v13  ;;  %v402_v33 = vrot.slane %v401_v23, 1  ;;  %v342_v35 = vld [vmem:[%s3176_s0 + $0xa38] sm:$0xff]  ;;  %v95_v12 = vld [vmem:[%s3176_s0 + $0x280] sm:$0x1] }
  0x66   :  { %v479_v34 = vadd.f32 %v478_v24, %v477_v59  ;;  %v556_v29 = vrot.slane %v555_v25, 2  ;;  %v862_v36 = vadd.f32 %v861_v26, %v294_v17  ;;  %v633_v39 = vadd.f32 %v632_v28, %v631_v18  ;;  %v35_v59 = vld [vmem:[%s3176_s0 + $0xa0] sm:$0xff]  ;;  %v137_v26 = vld [vmem:[%s3176_s0 + $0x3d0] sm:$0x1] }
  0x67   :  { %v710_v40 = vrot.slane %v709_v30, 4  ;;  %v787_v41 = vadd.f32 %v786_v57, %v785_v31  ;;  %v939_v42 = vadd.f32 %v938_v32, %v330_v22  ;;  %v403_v44 = vadd.f32 %v402_v33, %v401_v23  ;;  %v71_v8 = vld [vmem:[%s3176_s0 + $0x1c0] sm:$0xff]  ;;  %v101_v22 = vld [vmem:[%s3176_s0 + $0x2b0] sm:$0xff] }
  0x68   :  { %v480_v45 = vrot.slane %v479_v34, 1  ;;  %v557_v46 = vadd.f32 %v556_v29, %v555_v25  ;;  %v863_v47 = vadd.f32 %v862_v36, %v300_v27  ;;  %v634_v48 = vrot.slane %v633_v39, 2  ;;  %v107_v23 = vld [vmem:[%s3176_s0 + $0x2e0] sm:$0xff]  ;;  %v41_v25 = vld [vmem:[%s3176_s0 + $0xd0] sm:$0xff] }
  0x69   :  { %v711_v49 = vadd.f32 %v710_v40, %v709_v30  ;;  %v788_v50 = vrot.slane %v787_v41, 4  ;;  %v940_v37 = vadd.f32 %v939_v42, %v336_v21  ;;  %v942_v57 = vsel %vm356_vm0, %v348_v38, 0.0  ;;  %v77_v29 = vld [vmem:[%s3176_s0 + $0x1f0] sm:$0xff] }
  0x6a   :  { %v481_v43 = vadd.f32 %v480_v45, %v479_v34  ;;  %v558_v54 = vrot.slane %v557_v46, 1  ;;  %v865_v55 = vadd.f32 %v864_v11, %v863_v47  ;;  %v635_v58 = vadd.f32 %v634_v48, %v633_v39  ;;  %v65_v11 = vld [vmem:[%s3176_s0 + $0x190] sm:$0xff]  ;;  %v47_v34 = vld [vmem:[%s3176_s0 + $0x100] sm:$0xff] }
  0x6b   :  { %v712_v60 = vrot.slane %v711_v49, 2  ;;  %v789_v61 = vadd.f32 %v788_v50, %v787_v41  ;;  %v941_v62 = vadd.f32 %v940_v37, %v342_v35  ;;  %v1579_v3 = vpack.c.bf16 %v1041_v53, %v1040_v52  ;;  %v113_v36 = vld [vmem:[%s3176_s0 + $0x310] sm:$0xff]  ;;  %v143_v39 = vld [vmem:[%s3176_s0 + $0x400] sm:$0xff] }
  0x6c   :  { %v559_v56 = vadd.f32 %v558_v54, %v557_v46  ;;  %v866_v1 = vrot.slane %v865_v55, 4  ;;  %v1155_v2 = vsel %vm1127_vm1, %v481_v43, %v403_v44  ;;  %v636_v5 = vrot.slane %v635_v58, 1  ;;  %v149_v40 = vld [vmem:[%s3176_s0 + $0x430] sm:$0xff]  ;;  %v179_v41 = vld [vmem:[%s3176_s0 + $0x520] sm:$0x1] }
  0x6d   :  { %v713_v6 = vadd.f32 %v712_v60, %v711_v49  ;;  %v790_v7 = vrot.slane %v789_v61, 2  ;;  %v943_v9 = vadd.f32 %v942_v57, %v941_v62  ;;  %1580 = vmatpush3.bf16.msra.mxu0 %v1579_v3  ;;  %v378_v15 = vadd.f32 %v23_v0, %v17_v63  ;;  %v83_v48 = vld [vmem:[%s3176_s0 + $0x220] sm:$0xff]  ;;  %v185_v53 = vld [vmem:[%s3176_s0 + $0x550] sm:$0xff] }
  0x6e   :  { %v867_v13 = vadd.f32 %v866_v1, %v865_v55  ;;  %v1156_v14 = vsel %vm1129_vm2, %v559_v56, %v1155_v2  ;;  %v2440_v16 = vsel %vm356_vm0, %v53_v51, 0.0  ;;  %v637_v17 = vadd.f32 %v636_v5, %v635_v58  ;;  %v119_v49 = vld [vmem:[%s3176_s0 + $0x340] sm:$0xff]  ;;  %v221_v54 = vld [vmem:[%s3176_s0 + $0x670] sm:$0x1] }
  0x6f   :  { %v714_v18 = vrot.slane %v713_v6, 1  ;;  %v791_v19 = vadd.f32 %v790_v7, %v789_v61  ;;  %v944_v20 = vrot.slane %v943_v9, 4  ;;  %v379_v27 = vadd.f32 %v378_v15, %v29_v4  ;;  %v155_v50 = vld [vmem:[%s3176_s0 + $0x460] sm:$0xff]  ;;  %v89_v62 = vld [vmem:[%s3176_s0 + $0x250] sm:$0xff] }
  0x70   :  { %v868_v24 = vrot.slane %v867_v13, 2  ;;  %v456_v28 = vadd.f32 %v65_v11, %v59_v10  ;;  %v2458_v30 = vsel %vm356_vm0, %v95_v12, 0.0  ;;  %v1157_v33 = vsel %vm1131_vm3, %v637_v17, %v1156_v14  ;;  %v191_v43 = vld [vmem:[%s3176_s0 + $0x580] sm:$0xff]  ;;  %v125_v63 = vld [vmem:[%s3176_s0 + $0x370] sm:$0xff] }
  0x71   :  { %v715_v31 = vadd.f32 %v714_v18, %v713_v6  ;;  %v792_v32 = vrot.slane %v791_v19, 1  ;;  %v945_v21 = vadd.f32 %v944_v20, %v943_v9  ;;  %v380_v42 = vadd.f32 %v379_v27, %v35_v59  ;;  %v161_v0 = vld [vmem:[%s3176_s0 + $0x490] sm:$0xff]  ;;  %v227_v3 = vld [vmem:[%s3176_s0 + $0x6a0] sm:$0xff] }
  0x72   :  { %v869_v38 = vadd.f32 %v868_v24, %v867_v13  ;;  %v457_v35 = vadd.f32 %v456_v28, %v71_v8  ;;  %v534_v44 = vadd.f32 %v107_v23, %v101_v22  ;;  %v539_v37 = vsel %vm356_vm0, %v137_v26, 0.0  ;;  %v197_v2 = vld [vmem:[%s3176_s0 + $0x5b0] sm:$0xff]  ;;  %v131_v10 = vld [vmem:[%s3176_s0 + $0x3a0] sm:$0xff] }
  0x73   :  { %v793_v45 = vadd.f32 %v792_v32, %v791_v19  ;;  %v946_v46 = vrot.slane %v945_v21, 2  ;;  %v1158_v47 = vsel %vm1133_vm4, %v715_v31, %v1157_v33  ;;  %v381_v55 = vadd.f32 %v380_v42, %v41_v25  ;;  %v233_v4 = vld [vmem:[%s3176_s0 + $0x6d0] sm:$0xff]  ;;  %v263_v11 = vld [vmem:[%s3176_s0 + $0x7c0] sm:$0x1] }
  0x74   :  { %v870_v52 = vrot.slane %v869_v38, 1  ;;  %v458_v57 = vadd.f32 %v457_v35, %v77_v29  ;;  %v535_v58 = vadd.f32 %v534_v44, %v113_v36  ;;  %v612_v51 = vadd.f32 %v149_v40, %v143_v39  ;;  %v167_v15 = vld [vmem:[%s3176_s0 + $0x4c0] sm:$0xff]  ;;  %v173_v23 = vld [vmem:[%s3176_s0 + $0x4f0] sm:$0xff] }
  0x75   :  { %v947_v60 = vadd.f32 %v946_v46, %v945_v21  ;;  %v1159_v61 = vsel %vm1135_vm5, %v793_v45, %v1158_v47  ;;  %v617_v56 = vsel %vm356_vm0, %v179_v41, 0.0  ;;  %v382_v5 = vadd.f32 %v381_v55, %v47_v34  ;;  %v203_v17 = vld [vmem:[%s3176_s0 + $0x5e0] sm:$0xff]  ;;  %v269_v24 = vld [vmem:[%s3176_s0 + $0x7f0] sm:$0xff] }
  0x76   :  { %v871_v1 = vadd.f32 %v870_v52, %v869_v38  ;;  %v459_v6 = vadd.f32 %v458_v57, %v83_v48  ;;  %v536_v7 = vadd.f32 %v535_v58, %v119_v49  ;;  %v613_v12 = vadd.f32 %v612_v51, %v155_v50  ;;  %v239_v18 = vld [vmem:[%s3176_s0 + $0x700] sm:$0xff]  ;;  %v245_v31 = vld [vmem:[%s3176_s0 + $0x730] sm:$0xff] }
  0x77   :  { %v948_v9 = vrot.slane %v947_v60, 1  ;;  %v690_v13 = vadd.f32 %v191_v43, %v185_v53  ;;  %v695_v14 = vsel %vm356_vm0, %v221_v54, 0.0  ;;  %v384_v19 = vadd.f32 %v2440_v16, %v382_v5  ;;  %v275_v25 = vld [vmem:[%s3176_s0 + $0x820] sm:$0xff]  ;;  %v209_v16 = vld [vmem:[%s3176_s0 + $0x610] sm:$0xff] }
  0x78   :  { %v1160_v59 = vsel %vm1137_vm6, %v871_v1, %v1159_v61  ;;  %v460_v20 = vadd.f32 %v459_v6, %v89_v62  ;;  %v537_v8 = vadd.f32 %v536_v7, %v125_v63  ;;  %v614_v26 = vadd.f32 %v613_v12, %v161_v0  ;;  %v305_v32 = vld [vmem:[%s3176_s0 + $0x910] sm:$0x1]  ;;  %v215_v38 = vld [vmem:[%s3176_s0 + $0x640] sm:$0xff] }
  0x79   :  { %v949_v22 = vadd.f32 %v948_v9, %v947_v60  ;;  %v691_v27 = vadd.f32 %v690_v13, %v197_v2  ;;  %v768_v28 = vadd.f32 %v233_v4, %v227_v3  ;;  %v385_v21 = vrot.slane %v384_v19, 4  ;;  %v281_v39 = vld [vmem:[%s3176_s0 + $0x850] sm:$0xff]  ;;  %v311_v35 = vld [vmem:[%s3176_s0 + $0x940] sm:$0xff] }
  0x7a   :  { %v462_v33 = vadd.f32 %v2458_v30, %v460_v20  ;;  %v538_v34 = vadd.f32 %v537_v8, %v131_v10  ;;  %v773_v29 = vsel %vm356_vm0, %v263_v11, 0.0  ;;  %v615_v40 = vadd.f32 %v614_v26, %v167_v15  ;;  %v251_v30 = vld [vmem:[%s3176_s0 + $0x760] sm:$0xff]  ;;  %v317_v44 = vld [vmem:[%s3176_s0 + $0x970] sm:$0xff] }
  0x7b   :  { %v1161_v36 = vsel %vm1139_vm7, %v949_v22, %v1160_v59  ;;  %v692_v41 = vadd.f32 %v691_v27, %v203_v17  ;;  %v769_v42 = vadd.f32 %v768_v28, %v239_v18  ;;  %v386_v45 = vadd.f32 %v385_v21, %v384_v19  ;;  %v287_v49 = vld [vmem:[%s3176_s0 + $0x880] sm:$0xff]  ;;  %v257_v54 = vld [vmem:[%s3176_s0 + $0x790] sm:$0xff] }
  0x7c   :  { %1316 = vmatprep.mubr.f32.mxu1 %v1161_v36  ;;  %v463_v46 = vrot.slane %v462_v33, 4  ;;  %v540_v47 = vadd.f32 %v539_v37, %v538_v34  ;;  %v846_v48 = vadd.f32 %v275_v25, %v269_v24  ;;  %v616_v50 = vadd.f32 %v615_v40, %v173_v23  ;;  %v323_v55 = vld [vmem:[%s3176_s0 + $0x9a0] sm:$0xff]  ;;  %v293_v61 = vld [vmem:[%s3176_s0 + $0x8b0] sm:$0xff]  ;;  %v1061_v40 = vld [vmem:[%s3177_s1 + $0x2a8] sm:$0xff] }
  0x7d   :  { %v693_v52 = vadd.f32 %v692_v41, %v209_v16  ;;  %v770_v53 = vadd.f32 %v769_v42, %v245_v31  ;;  %v851_v43 = vsel %vm356_vm0, %v305_v32, 0.0  ;;  %v387_v57 = vrot.slane %v386_v45, 2  ;;  %v329_v1 = vld [vmem:[%s3176_s0 + $0x9d0] sm:$0xff]  ;;  %v299_v6 = vld [vmem:[%s3176_s0 + $0x8e0] sm:$0xff]  ;;  %v1059_v32 = vld [vmem:[%s3177_s1 + $0x298] sm:$0xff] }
  0x7e   :  { %v464_v37 = vadd.f32 %v463_v46, %v462_v33  ;;  %v541_v58 = vrot.slane %v540_v47, 4  ;;  %v847_v60 = vadd.f32 %v846_v48, %v281_v39  ;;  %v618_v62 = vadd.f32 %v617_v56, %v616_v50  ;;  %v335_v56 = vld [vmem:[%s3176_s0 + $0xa00] sm:$0xff]  ;;  %v1058_v31 = vld [vmem:[%s3177_s1 + $0x290] sm:$0xff] }
  0x7f   :  { %v694_v63 = vadd.f32 %v693_v52, %v215_v38  ;;  %v771_v0 = vadd.f32 %v770_v53, %v251_v30  ;;  %v924_v51 = vadd.f32 %v317_v44, %v311_v35  ;;  %v388_v2 = vadd.f32 %v387_v57, %v386_v45  ;;  %v347_v17 = vld [vmem:[%s3176_s0 + $0xa60] sm:$0x1]  ;;  %v1042_v21 = vld [vmem:[%s3177_s1 + $0x210] sm:$0xff]  ;;  %v1043_v38 = vld [vmem:[%s3177_s1 + $0x218] sm:$0xff] }
  0x80   :  { %v465_v3 = vrot.slane %v464_v37, 2  ;;  %v542_v4 = vadd.f32 %v541_v58, %v540_v47  ;;  %v848_v5 = vadd.f32 %v847_v60, %v287_v49  ;;  %v619_v7 = vrot.slane %v618_v62, 4  ;;  %v1060_v39 = vld [vmem:[%s3177_s1 + $0x2a0] sm:$0xff]  ;;  %v2628_v45 = vld [vmem:[%s3177_s1 + $0x228] sm:$0xff]  ;;  %v2633_v46 = vld [vmem:[%s3177_s1 + $0x2b0] sm:$0xff] }
  0x81   :  { %v696_v9 = vadd.f32 %v695_v14, %v694_v63  ;;  %v772_v10 = vadd.f32 %v771_v0, %v257_v54  ;;  %v925_v11 = vadd.f32 %v924_v51, %v323_v55  ;;  %v389_v12 = vrot.slane %v388_v2, 1  ;;  %v341_v14 = vld [vmem:[%s3176_s0 + $0xa30] sm:$0xff]  ;;  %v2623_v44 = vld [vmem:[%s3177_s1 + $0x220] sm:$0xff]  ;;  %v2639_v52 = vld [vmem:[%s3177_s1 + $0x2b8] sm:$0xff] }
  0x82   :  { %v466_v13 = vadd.f32 %v465_v3, %v464_v37  ;;  %v543_v59 = vrot.slane %v542_v4, 2  ;;  %v849_v15 = vadd.f32 %v848_v5, %v293_v61  ;;  %v620_v18 = vadd.f32 %v619_v7, %v618_v62  ;;  %v2644_v53 = vld [vmem:[%s3177_s1 + $0x230] sm:$0xff]  ;;  %v2654_v58 = vld [vmem:[%s3177_s1 + $0x2c0] sm:$0xff]  ;;  %v2659_v60 = vld [vmem:[%s3177_s1 + $0x2c8] sm:$0xff] }
  0x83   :  { %v697_v19 = vrot.slane %v696_v9, 4  ;;  %v774_v20 = vadd.f32 %v773_v29, %v772_v10  ;;  %v926_v8 = vadd.f32 %v925_v11, %v329_v1  ;;  %v390_v22 = vadd.f32 %v389_v12, %v388_v2  ;;  %v2664_v61 = vld [vmem:[%s3177_s1 + $0x240] sm:$0xff]  ;;  %v2669_v62 = vld [vmem:[%s3177_s1 + $0x248] sm:$0xff]  ;;  %v2674_v63 = vld [vmem:[%s3177_s1 + $0x2d0] sm:$0xff] }
  0x84   :  { %v467_v23 = vrot.slane %v466_v13, 1  ;;  %v544_v24 = vadd.f32 %v543_v59, %v542_v4  ;;  %v850_v25 = vadd.f32 %v849_v15, %v299_v6  ;;  %v621_v26 = vrot.slane %v620_v18, 2  ;;  %v2680_v3 = vld [vmem:[%s3177_s1 + $0x2d8] sm:$0xff]  ;;  %v2685_v4 = vld [vmem:[%s3177_s1 + $0x250] sm:$0xff]  ;;  %v2695_v11 = vld [vmem:[%s3177_s1 + $0x2e0] sm:$0xff] }
  0x85   :  { %v698_v27 = vadd.f32 %v697_v19, %v696_v9  ;;  %v775_v28 = vrot.slane %v774_v20, 4  ;;  %v927_v16 = vadd.f32 %v926_v8, %v335_v56  ;;  %v929_v36 = vsel %vm356_vm0, %v347_v17, 0.0  ;;  %v2690_v5 = vld [vmem:[%s3177_s1 + $0x258] sm:$0xff]  ;;  %v2700_v56 = vld [vmem:[%s3177_s1 + $0x2e8] sm:$0xff]  ;;  %v2705_v12 = vld [vmem:[%s3177_s1 + $0x260] sm:$0xff] }
  0x86   :  { %v468_v33 = vadd.f32 %v467_v23, %v466_v13  ;;  %v545_v34 = vrot.slane %v544_v24, 1  ;;  %v852_v29 = vadd.f32 %v851_v43, %v850_v25  ;;  %v622_v41 = vadd.f32 %v621_v26, %v620_v18  ;;  %v2649_v43 = vld [vmem:[%s3177_s1 + $0x238] sm:$0xff]  ;;  %v2710_v13 = vld [vmem:[%s3177_s1 + $0x268] sm:$0xff]  ;;  %v2721_v19 = vld [vmem:[%s3177_s1 + $0x2f0] sm:$0xff] }
  0x87   :  { %v699_v42 = vrot.slane %v698_v27, 2  ;;  %v776_v30 = vadd.f32 %v775_v28, %v774_v20  ;;  %v928_v35 = vadd.f32 %v927_v16, %v341_v14  ;;  %v1581_v50 = vpack.c.bf16 %v1059_v32, %v1058_v31  ;;  %v2726_v20 = vld [vmem:[%s3177_s1 + $0x2f8] sm:$0xff]  ;;  %v2731_v8 = vld [vmem:[%s3177_s1 + $0x270] sm:$0xff]  ;;  %v20_v26 = vld [vmem:[%s3176_s0 + $0x28] sm:$0xff] }
  0x88   :  { %v546_v47 = vadd.f32 %v545_v34, %v544_v24  ;;  %v853_v48 = vrot.slane %v852_v29, 4  ;;  %v1148_v49 = vsel %vm1127_vm1, %v468_v33, %v390_v22  ;;  %v623_v54 = vrot.slane %v622_v41, 1  ;;  %v2737_v25 = vld [vmem:[%s3177_s1 + $0x278] sm:$0xff]  ;;  %v56_v33 = vld [vmem:[%s3176_s0 + $0x148] sm:$0x1] }
  0x89   :  { %v700_v55 = vadd.f32 %v699_v42, %v698_v27  ;;  %v777_v57 = vrot.slane %v776_v30, 2  ;;  %v930_v37 = vadd.f32 %v929_v36, %v928_v35  ;;  %1582 = vmatprep.subr.bf16.mxu0 %v1581_v50  ;;  %v1583_v1 = vpack.c.bf16 %v1043_v38, %v1042_v21  ;;  %v26_v27 = vld [vmem:[%s3176_s0 + $0x58] sm:$0xff]  ;;  %v32_v21 = vld [vmem:[%s3176_s0 + $0x88] sm:$0xff] }
  0x8a   :  { %v854_v0 = vadd.f32 %v853_v48, %v852_v29  ;;  %v1149_v51 = vsel %vm1129_vm2, %v546_v47, %v1148_v49  ;;  %v1585_v2 = vpack.c.bf16 %v1061_v40, %v1060_v39  ;;  %v624_v6 = vadd.f32 %v623_v54, %v622_v41  ;;  %v62_v34 = vld [vmem:[%s3176_s0 + $0x178] sm:$0xff]  ;;  %v68_v29 = vld [vmem:[%s3176_s0 + $0x1a8] sm:$0xff] }
  0x8b   :  { %v701_v7 = vrot.slane %v700_v55, 1  ;;  %v778_v9 = vadd.f32 %v777_v57, %v776_v30  ;;  %v931_v10 = vrot.slane %v930_v37, 4  ;;  %1584 = vmatpush3.bf16.msra.mxu0 %v1583_v1  ;;  %v1587_v15 = vpack.c.bf16 %v2628_v45, %v2623_v44  ;;  %v74_v41 = vld [vmem:[%s3176_s0 + $0x1d8] sm:$0xff]  ;;  %v104_v30 = vld [vmem:[%s3176_s0 + $0x2c8] sm:$0xff] }
  0x8c   :  { %v855_v59 = vrot.slane %v854_v0, 2  ;;  %v1589_v17 = vpack.c.bf16 %v2639_v52, %v2633_v46  ;;  %v1591_v18 = vpack.c.bf16 %v2649_v43, %v2644_v53  ;;  %v1150_v24 = vsel %vm1131_vm3, %v624_v6, %v1149_v51  ;;  %1586 = vmatprep.subr.bf16.mxu0 %v1585_v2  ;;  %v98_v42 = vld [vmem:[%s3176_s0 + $0x298] sm:$0x1]  ;;  %v116_v49 = vld [vmem:[%s3176_s0 + $0x328] sm:$0xff] }
  0x8d   :  { %v702_v14 = vadd.f32 %v701_v7, %v700_v55  ;;  %v779_v22 = vrot.slane %v778_v9, 1  ;;  %v932_v23 = vadd.f32 %v931_v10, %v930_v37  ;;  %v1593_v16 = vpack.c.bf16 %v2659_v60, %v2654_v58  ;;  %v38_v47 = vld [vmem:[%s3176_s0 + $0xb8] sm:$0xff]  ;;  %v140_v50 = vld [vmem:[%s3176_s0 + $0x3e8] sm:$0x1] }
  0x8e   :  { %v856_v28 = vadd.f32 %v855_v59, %v854_v0  ;;  %v1595_v31 = vpack.c.bf16 %v2669_v62, %v2664_v61  ;;  %v1597_v32 = vpack.c.bf16 %v2680_v3, %v2674_v63  ;;  %v1599_v40 = vpack.c.bf16 %v2690_v5, %v2685_v4  ;;  %v110_v48 = vld [vmem:[%s3176_s0 + $0x2f8] sm:$0xff]  ;;  %v80_v57 = vld [vmem:[%s3176_s0 + $0x208] sm:$0xff] }
  0x8f   :  { %v780_v36 = vadd.f32 %v779_v22, %v778_v9  ;;  %v933_v38 = vrot.slane %v932_v23, 2  ;;  %v1151_v39 = vsel %vm1133_vm4, %v702_v14, %v1150_v24  ;;  %1588 = vmatpush3.bf16.msra.mxu0 %v1587_v15  ;;  %v1601_v44 = vpack.c.bf16 %v2700_v56, %v2695_v11  ;;  %v146_v37 = vld [vmem:[%s3176_s0 + $0x418] sm:$0xff]  ;;  %v152_v58 = vld [vmem:[%s3176_s0 + $0x448] sm:$0xff] }
  0x90   :  { %v857_v35 = vrot.slane %v856_v28, 1  ;;  %v1603_v45 = vpack.c.bf16 %v2710_v13, %v2705_v12  ;;  %v1605_v46 = vpack.c.bf16 %v2726_v20, %v2721_v19  ;;  %1590 = vmatprep.subr.bf16.mxu0 %v1589_v17  ;;  %v1607_v55 = vpack.c.bf16 %v2737_v25, %v2731_v8  ;;  %v182_v60 = vld [vmem:[%s3176_s0 + $0x538] sm:$0x1]  ;;  %v44_v1 = vld [vmem:[%s3176_s0 + $0xe8] sm:$0xff] }
  0x91   :  { %v934_v52 = vadd.f32 %v933_v38, %v932_v23  ;;  %v1152_v54 = vsel %vm1135_vm5, %v780_v36, %v1151_v39  ;;  %v417_v0 = vadd.f32 %v26_v27, %v20_v26  ;;  %v122_v2 = vld [vmem:[%s3176_s0 + $0x358] sm:$0xff]  ;;  %v188_v7 = vld [vmem:[%s3176_s0 + $0x568] sm:$0xff]  ;;  %v2824_v10 = vsel %vm356_vm0, %v56_v33, 0.0 }
  0x92   :  { %v858_v51 = vadd.f32 %v857_v35, %v856_v28  ;;  %v158_v6 = vld [vmem:[%s3176_s0 + $0x478] sm:$0xff]  ;;  %v495_v59 = vadd.f32 %v68_v29, %v62_v34  ;;  %v2827_v15 = vsel %vm356_vm0, %v98_v42, 0.0  ;;  %v224_v22 = vld [vmem:[%s3176_s0 + $0x688] sm:$0x1]  ;;  %v573_v27 = vadd.f32 %v110_v48, %v104_v30 }
  0x93   :  { %v194_v9 = vld [vmem:[%s3176_s0 + $0x598] sm:$0xff]  ;;  %v935_v17 = vrot.slane %v934_v52, 1  ;;  %v236_v24 = vld [vmem:[%s3176_s0 + $0x6e8] sm:$0xff]  ;;  %v418_v26 = vadd.f32 %v417_v0, %v32_v21  ;;  %v2842_v28 = vsel %vm356_vm0, %v140_v50, 0.0  ;;  %1592 = vmatpush3.bf16.msra.mxu0 %v1591_v18  ;;  %v651_v38 = vadd.f32 %v152_v58, %v146_v37 }
  0x94   :  { %v86_v14 = vld [vmem:[%s3176_s0 + $0x238] sm:$0xff]  ;;  %v1153_v33 = vsel %vm1137_vm6, %v858_v51, %v1152_v54  ;;  %v128_v29 = vld [vmem:[%s3176_s0 + $0x388] sm:$0xff]  ;;  %v496_v36 = vadd.f32 %v495_v59, %v74_v41  ;;  %v2858_v39 = vsel %vm356_vm0, %v182_v60, 0.0 }
  0x95   :  { %v230_v23 = vld [vmem:[%s3176_s0 + $0x6b8] sm:$0xff]  ;;  %v200_v21 = vld [vmem:[%s3176_s0 + $0x5c8] sm:$0xff] }
  0x96   :  { %v50_v34 = vld [vmem:[%s3176_s0 + $0x118] sm:$0xff] }
  0x97   :  { %8 = vsyncpa [#allocation3], 0  ;;  %v936_v53 = vadd.f32 %v935_v17, %v934_v52  ;;  %1594 = vmatprep.subr.bf16.mxu0 %v1593_v16  ;;  %v92_v43 = vld [vmem:[%s3176_s0 + $0x268] sm:$0xff]  ;;  %v242_v42 = vld [vmem:[%s3176_s0 + $0x718] sm:$0xff]  ;;  %v419_v30 = vadd.f32 %v418_v26, %v38_v47  ;;  %v574_v35 = vadd.f32 %v573_v27, %v116_v49  ;;  %v729_v48 = vadd.f32 %v194_v9, %v188_v7  ;;  %s1634_s5 = smov [#allocation2]  }
  0x98   :  { %v164_v18 = vld [vmem:[%s3176_s0 + $0x4a8] sm:$0xff]  ;;  %v266_v41 = vld [vmem:[%s3176_s0 + $0x7d8] sm:$0x1]  ;;  %v497_v37 = vadd.f32 %v496_v36, %v80_v57  ;;  %v652_v47 = vadd.f32 %v651_v38, %v158_v6  ;;  %v734_v49 = vsel %vm356_vm0, %v224_v22, 0.0  ;;  %v807_v58 = vadd.f32 %v236_v24, %v230_v23  ;;  %1596 = vmatpush3.bf16.msra.mxu0 %v1595_v31  ;;  %v25_v8 = vld [vmem:[%s3176_s0 + $0x50] sm:$0xff]  ;;  %s1399_s6 = sshll.u32 %s1634_s5, 4  ;;  %s1400_s6 = int_to_ptr.vmem [resolvable:$true] %s1399_s6 }
  0x99   :  { %v134_v16 = vld [vmem:[%s3176_s0 + $0x3b8] sm:$0xff]  ;;  %v272_v52 = vld [vmem:[%s3176_s0 + $0x808] sm:$0xff]  ;;  %v1154_v60 = vsel %vm1139_vm7, %v936_v53, %v1153_v33  ;;  %v420_v9 = vadd.f32 %v419_v30, %v44_v1  ;;  %v575_v57 = vadd.f32 %v574_v35, %v122_v2  ;;  %v730_v6 = vadd.f32 %v729_v48, %v200_v21  ;;  %1598 = vmatprep.subr.bf16.mxu0 %v1597_v32  ;;  %s1610_s7 = scalar_lea.vmem %s1400_s6, 128  ;;  %p1615_p1 = scmp.lt.s32.totalorder %s1400_s6, %s1400_s6 }
  0x9a   :  { %v206_v50 = vld [vmem:[%s3176_s0 + $0x5f8] sm:$0xff]  ;;  %v248_v51 = vld [vmem:[%s3176_s0 + $0x748] sm:$0xff]  ;;  %1317 = vmatmul.mubr.f32.vlgmr.msra.gmra.mrb[0].mxu1 %v1154_v60  ;;  %v498_v1 = vadd.f32 %v497_v37, %v86_v14  ;;  %v653_v2 = vadd.f32 %v652_v47, %v164_v18  ;;  %v808_v23 = vadd.f32 %v807_v58, %v242_v42  ;;  %v812_v24 = vsel %vm356_vm0, %v266_v41, 0.0  ;;  %p1611_p0 = scmp.ne.s32.totalorder %s1400_s6, %s1610_s7  ;;  %p1616_p2 = scmp.lt.s32.totalorder %s1610_s7, %s1610_s7 }
  0x9b   :  { %v278_v54 = vld [vmem:[%s3176_s0 + $0x838] sm:$0xff]  ;;  %v308_v7 = vld [vmem:[%s3176_s0 + $0x928] sm:$0x1]  ;;  %v421_v14 = vadd.f32 %v420_v9, %v50_v34  ;;  %v576_v26 = vadd.f32 %v575_v57, %v128_v29  ;;  %v731_v27 = vadd.f32 %v730_v6, %v206_v50 }
  0x9c   :  { %v170_v0 = vld [vmem:[%s3176_s0 + $0x4d8] sm:$0xff]  ;;  %v176_v59 = vld [vmem:[%s3176_s0 + $0x508] sm:$0xff]  ;;  %v885_v33 = vadd.f32 %v278_v54, %v272_v52  ;;  %v499_v32 = vadd.f32 %v498_v1, %v92_v43  ;;  %v809_v36 = vadd.f32 %v808_v23, %v248_v51  ;;  %v890_v38 = vsel %vm356_vm0, %v308_v7, 0.0  ;;  %1600 = vmatpush3.bf16.msra.mxu0 %v1599_v40  ;;  %p1617_p3 = por %p1616_p2, %p1615_p1 }
  0x9d   :  { %v212_v17 = vld [vmem:[%s3176_s0 + $0x628] sm:$0xff]  ;;  %v254_v61 = vld [vmem:[%s3176_s0 + $0x778] sm:$0xff]  ;;  %v654_v21 = vadd.f32 %v653_v2, %v170_v0  ;;  %v423_v53 = vadd.f32 %v2824_v10, %v421_v14  ;;  %v577_v18 = vadd.f32 %v576_v26, %v134_v16  ;;  %1602 = vmatprep.subr.bf16.mxu0 %v1601_v44 }
  0x9e   :  { %v284_v22 = vld [vmem:[%s3176_s0 + $0x868] sm:$0xff]  ;;  %v314_v62 = vld [vmem:[%s3176_s0 + $0x958] sm:$0xff]  ;;  %v732_v42 = vadd.f32 %v731_v27, %v212_v17  ;;  %v501_v30 = vadd.f32 %v2827_v15, %v499_v32  ;;  %v810_v48 = vadd.f32 %v809_v36, %v254_v61  ;;  %p1618_p4 = pnand %p1617_p3, %p1611_p0 }
  0x9f   :  { %v320_v31 = vld [vmem:[%s3176_s0 + $0x988] sm:$0xff]  ;;  %v218_v63 = vld [vmem:[%s3176_s0 + $0x658] sm:$0xff]  ;;  %v886_v41 = vadd.f32 %v885_v33, %v284_v22  ;;  %v655_v35 = vadd.f32 %v654_v21, %v176_v59  ;;  %v424_v16 = vrot.slane %v423_v53, 4  ;;  %v579_v4 = vadd.f32 %v2842_v28, %v577_v18 }
  0xa0   :  { %v290_v3 = vld [vmem:[%s3176_s0 + $0x898] sm:$0xff]  ;;  %v260_v34 = vld [vmem:[%s3176_s0 + $0x7a8] sm:$0xff]  ;;  %v963_v50 = vadd.f32 %v320_v31, %v314_v62  ;;  %v733_v5 = vadd.f32 %v732_v42, %v218_v63  ;;  %v502_v52 = vrot.slane %v501_v30, 4  ;;  %1604 = vmatpush3.bf16.msra.mxu0 %v1603_v45 }
  0xa1   :  { %v326_v29 = vld [vmem:[%s3176_s0 + $0x9b8] sm:$0xff]  ;;  %v296_v43 = vld [vmem:[%s3176_s0 + $0x8c8] sm:$0xff]  ;;  %v887_v40 = vadd.f32 %v886_v41, %v290_v3  ;;  %v657_v54 = vadd.f32 %v2858_v39, %v655_v35  ;;  %v811_v37 = vadd.f32 %v810_v48, %v260_v34  ;;  %v425_v56 = vadd.f32 %v424_v16, %v423_v53  ;;  %1606 = vmatprep.subr.bf16.mxu0 %v1605_v46  ;;  %v19_v3 = vld [vmem:[%s3176_s0 + $0x20] sm:$0xff] }
  0xa2   :  { %v332_v10 = vld [vmem:[%s3176_s0 + $0x9e8] sm:$0xff]  ;;  %v302_v15 = vld [vmem:[%s3176_s0 + $0x8f8] sm:$0xff]  ;;  %v964_v47 = vadd.f32 %v963_v50, %v326_v29  ;;  %v580_v44 = vrot.slane %v579_v4, 4  ;;  %v735_v58 = vadd.f32 %v734_v49, %v733_v5  ;;  %v503_v28 = vadd.f32 %v502_v52, %v501_v30  ;;  %v31_v53 = vld [vmem:[%s3176_s0 + $0x80] sm:$0xff] }
  0xa3   :  { %v338_v11 = vld [vmem:[%s3176_s0 + $0xa18] sm:$0xff]  ;;  %v888_v60 = vadd.f32 %v887_v40, %v296_v43  ;;  %v658_v0 = vrot.slane %v657_v54, 4  ;;  %v813_v51 = vadd.f32 %v812_v24, %v811_v37  ;;  %v344_v39 = vld [vmem:[%s3176_s0 + $0xa48] sm:$0xff]  ;;  %v426_v9 = vrot.slane %v425_v56, 2  ;;  %v37_v43 = vld [vmem:[%s3176_s0 + $0xb0] sm:$0xff] }
  0xa4   :  { %v965_v7 = vadd.f32 %v964_v47, %v332_v10  ;;  %v581_v57 = vadd.f32 %v580_v44, %v579_v4  ;;  %v736_v49 = vrot.slane %v735_v58, 4  ;;  %v504_v59 = vrot.slane %v503_v28, 2  ;;  %v350_v45 = vld [vmem:[%s3176_s0 + $0xa78] sm:$0x1]  ;;  %1608 = vmatpush3.bf16.msra.mxu0 %v1607_v55  ;;  %v55_v30 = vld [vmem:[%s3176_s0 + $0x140] sm:$0x1] }
  0xa5   :  { %v889_v6 = vadd.f32 %v888_v60, %v302_v15  ;;  %v659_v17 = vadd.f32 %v658_v0, %v657_v54  ;;  %v814_v12 = vrot.slane %v813_v51, 4  ;;  %v427_v22 = vadd.f32 %v426_v9, %v425_v56  ;;  %v43_v4 = vld [vmem:[%s3176_s0 + $0xe0] sm:$0xff]  ;;  %v61_v5 = vld [vmem:[%s3176_s0 + $0x170] sm:$0xff] }
  0xa6   :  { %v966_v13 = vadd.f32 %v965_v7, %v338_v11  ;;  %v582_v1 = vrot.slane %v581_v57, 2  ;;  %v737_v19 = vadd.f32 %v736_v49, %v735_v58  ;;  %v505_v46 = vadd.f32 %v504_v59, %v503_v28  ;;  %v67_v40 = vld [vmem:[%s3176_s0 + $0x1a0] sm:$0xff]  ;;  %v73_v15 = vld [vmem:[%s3176_s0 + $0x1d0] sm:$0xff] }
  0xa7   :  { %v891_v20 = vadd.f32 %v890_v38, %v889_v6  ;;  %v660_v2 = vrot.slane %v659_v17, 2  ;;  %v815_v23 = vadd.f32 %v814_v12, %v813_v51  ;;  %v428_v61 = vrot.slane %v427_v22, 1  ;;  %v97_v47 = vld [vmem:[%s3176_s0 + $0x290] sm:$0x1]  ;;  %v103_v11 = vld [vmem:[%s3176_s0 + $0x2c0] sm:$0xff] }
  0xa8   :  { %v967_v24 = vadd.f32 %v966_v13, %v344_v39  ;;  %v583_v62 = vadd.f32 %v582_v1, %v581_v57  ;;  %v738_v31 = vrot.slane %v737_v19, 2  ;;  %v506_v26 = vrot.slane %v505_v46, 1  ;;  %v109_v56 = vld [vmem:[%s3176_s0 + $0x2f0] sm:$0xff]  ;;  %v79_v51 = vld [vmem:[%s3176_s0 + $0x200] sm:$0xff] }
  0xa9   :  { %v892_v14 = vrot.slane %v891_v20, 4  ;;  %v661_v27 = vadd.f32 %v660_v2, %v659_v17  ;;  %v816_v33 = vrot.slane %v815_v23, 2  ;;  %v968_v63 = vsel %vm356_vm0, %v350_v45, 0.0  ;;  %v49_v0 = vld [vmem:[%s3176_s0 + $0x110] sm:$0xff]  ;;  %v115_v7 = vld [vmem:[%s3176_s0 + $0x320] sm:$0xff] }
  0xaa   :  { %v429_v25 = vadd.f32 %v428_v61, %v427_v22  ;;  %v584_v55 = vrot.slane %v583_v62, 1  ;;  %v739_v32 = vadd.f32 %v738_v31, %v737_v19  ;;  %v507_v36 = vadd.f32 %v506_v26, %v505_v46  ;;  %v139_v39 = vld [vmem:[%s3176_s0 + $0x3e0] sm:$0x1]  ;;  %v145_v6 = vld [vmem:[%s3176_s0 + $0x410] sm:$0xff] }
  0xab   :  { %v893_v21 = vadd.f32 %v892_v14, %v891_v20  ;;  %v662_v38 = vrot.slane %v661_v27, 1  ;;  %v817_v34 = vadd.f32 %v816_v33, %v815_v23  ;;  %v969_v29 = vadd.f32 %v968_v63, %v967_v24  ;;  %v151_v59 = vld [vmem:[%s3176_s0 + $0x440] sm:$0xff]  ;;  %v181_v17 = vld [vmem:[%s3176_s0 + $0x530] sm:$0x1] }
  0xac   :  { %v585_v18 = vadd.f32 %v584_v55, %v583_v62  ;;  %v740_v42 = vrot.slane %v739_v32, 1  ;;  %v404_v35 = vadd.f32 %v25_v8, %v19_v3  ;;  %v1169_v16 = vsel %vm1127_vm1, %v507_v36, %v429_v25  ;;  %v85_v1 = vld [vmem:[%s3176_s0 + $0x230] sm:$0xff]  ;;  %v187_v19 = vld [vmem:[%s3176_s0 + $0x560] sm:$0xff] }
  0xad   :  { %v894_v41 = vrot.slane %v893_v21, 2  ;;  %v663_v48 = vadd.f32 %v662_v38, %v661_v27  ;;  %v818_v50 = vrot.slane %v817_v34, 1  ;;  %v970_v10 = vrot.slane %v969_v29, 4  ;;  %v193_v20 = vld [vmem:[%s3176_s0 + $0x590] sm:$0xff]  ;;  %v223_v62 = vld [vmem:[%s3176_s0 + $0x680] sm:$0x1] }
  0xae   :  { %v741_v52 = vadd.f32 %v740_v42, %v739_v32  ;;  %v1170_v37 = vsel %vm1129_vm2, %v585_v18, %v1169_v16  ;;  %v405_v44 = vadd.f32 %v404_v35, %v31_v53  ;;  %v409_v9 = vsel %vm356_vm0, %v55_v30, 0.0  ;;  %v121_v24 = vld [vmem:[%s3176_s0 + $0x350] sm:$0xff]  ;;  %v91_v33 = vld [vmem:[%s3176_s0 + $0x260] sm:$0xff] }
  0xaf   :  { %v895_v54 = vadd.f32 %v894_v41, %v893_v21  ;;  %v819_v58 = vadd.f32 %v818_v50, %v817_v34  ;;  %v971_v60 = vadd.f32 %v970_v10, %v969_v29  ;;  %v1171_v28 = vsel %vm1131_vm3, %v663_v48, %v1170_v37  ;;  %v157_v61 = vld [vmem:[%s3176_s0 + $0x470] sm:$0xff]  ;;  %v199_v63 = vld [vmem:[%s3176_s0 + $0x5c0] sm:$0xff] }
  0xb0   :  { %v1172_v49 = vsel %vm1133_vm4, %v741_v52, %v1171_v28  ;;  %v406_v12 = vadd.f32 %v405_v44, %v37_v43  ;;  %v482_v13 = vadd.f32 %v67_v40, %v61_v5  ;;  %v487_v46 = vsel %vm356_vm0, %v97_v47, 0.0  ;;  %v229_v3 = vld [vmem:[%s3176_s0 + $0x6b0] sm:$0xff]  ;;  %v235_v8 = vld [vmem:[%s3176_s0 + $0x6e0] sm:$0xff] }
  0xb1   :  { %v896_v57 = vrot.slane %v895_v54, 1  ;;  %v972_v45 = vrot.slane %v971_v60, 2  ;;  %v1173_v22 = vsel %vm1135_vm5, %v819_v58, %v1172_v49  ;;  %v560_v2 = vadd.f32 %v109_v56, %v103_v11  ;;  %v127_v36 = vld [vmem:[%s3176_s0 + $0x380] sm:$0xff]  ;;  %v265_v34 = vld [vmem:[%s3176_s0 + $0x7d0] sm:$0x1] }
  0xb2   :  { %v407_v31 = vadd.f32 %v406_v12, %v43_v4  ;;  %v483_v14 = vadd.f32 %v482_v13, %v73_v15  ;;  %v565_v26 = vsel %vm356_vm0, %v139_v39, 0.0  ;;  %v638_v55 = vadd.f32 %v151_v59, %v145_v6  ;;  %v163_v38 = vld [vmem:[%s3176_s0 + $0x4a0] sm:$0xff]  ;;  %v133_v41 = vld [vmem:[%s3176_s0 + $0x3b0] sm:$0xff] }
  0xb3   :  { %v897_v23 = vadd.f32 %v896_v57, %v895_v54  ;;  %v973_v27 = vadd.f32 %v972_v45, %v971_v60  ;;  %v561_v25 = vadd.f32 %v560_v2, %v115_v7  ;;  %v643_v32 = vsel %vm356_vm0, %v181_v17, 0.0  ;;  %v205_v43 = vld [vmem:[%s3176_s0 + $0x5f0] sm:$0xff]  ;;  %v271_v16 = vld [vmem:[%s3176_s0 + $0x800] sm:$0xff] }
  0xb4   :  { %v408_v29 = vadd.f32 %v407_v31, %v49_v0  ;;  %v484_v53 = vadd.f32 %v483_v14, %v79_v51  ;;  %v716_v18 = vadd.f32 %v193_v20, %v187_v19  ;;  %v241_v30 = vld [vmem:[%s3176_s0 + $0x710] sm:$0xff]  ;;  %v639_v48 = vadd.f32 %v638_v55, %v157_v61  ;;  %v211_v37 = vld [vmem:[%s3176_s0 + $0x620] sm:$0xff] }
  0xb5   :  { %v1174_v21 = vsel %vm1137_vm6, %v897_v23, %v1173_v22  ;;  %v974_v42 = vrot.slane %v973_v27, 1  ;;  %v562_v35 = vadd.f32 %v561_v25, %v121_v24  ;;  %v721_v50 = vsel %vm356_vm0, %v223_v62, 0.0  ;;  %v169_v10 = vld [vmem:[%s3176_s0 + $0x4d0] sm:$0xff]  ;;  %v247_v47 = vld [vmem:[%s3176_s0 + $0x740] sm:$0xff] }
  0xb6   :  { %v277_v4 = vld [vmem:[%s3176_s0 + $0x830] sm:$0xff]  ;;  %v410_v5 = vadd.f32 %v409_v9, %v408_v29  ;;  %v485_v40 = vadd.f32 %v484_v53, %v85_v1  ;;  %v717_v15 = vadd.f32 %v716_v18, %v199_v63  ;;  %v794_v52 = vadd.f32 %v235_v8, %v229_v3  ;;  %v175_v58 = vld [vmem:[%s3176_s0 + $0x500] sm:$0xff] }
  0xb7   :  { %v975_v54 = vadd.f32 %v974_v42, %v973_v27  ;;  %v563_v11 = vadd.f32 %v562_v35, %v127_v36  ;;  %v640_v56 = vadd.f32 %v639_v48, %v163_v38  ;;  %v799_v44 = vsel %vm356_vm0, %v265_v34, 0.0  ;;  %v283_v60 = vld [vmem:[%s3176_s0 + $0x860] sm:$0xff]  ;;  %v217_v57 = vld [vmem:[%s3176_s0 + $0x650] sm:$0xff] }
  0xb8   :  { %v307_v28 = vld [vmem:[%s3176_s0 + $0x920] sm:$0x1]  ;;  %v411_v0 = vrot.slane %v410_v5, 4  ;;  %v486_v51 = vadd.f32 %v485_v40, %v91_v33  ;;  %v718_v7 = vadd.f32 %v717_v15, %v205_v43  ;;  %v795_v39 = vadd.f32 %v794_v52, %v241_v30  ;;  %v253_v49 = vld [vmem:[%s3176_s0 + $0x770] sm:$0xff] }
  0xb9   :  { %v1175_v9 = vsel %vm1139_vm7, %v975_v54, %v1174_v21  ;;  %v564_v6 = vadd.f32 %v563_v11, %v133_v41  ;;  %v641_v59 = vadd.f32 %v640_v56, %v169_v10  ;;  %v872_v17 = vadd.f32 %v277_v4, %v271_v16  ;;  %v289_v12 = vld [vmem:[%s3176_s0 + $0x890] sm:$0xff]  ;;  %v319_v45 = vld [vmem:[%s3176_s0 + $0x980] sm:$0xff] }
  0xba   :  { %1386 = vmatprep.mubr.f32.mxu0 %v1175_v9  ;;  %v313_v13 = vld [vmem:[%s3176_s0 + $0x950] sm:$0xff]  ;;  %v412_v22 = vadd.f32 %v411_v0, %v410_v5  ;;  %v488_v1 = vadd.f32 %v487_v46, %v486_v51  ;;  %v719_v19 = vadd.f32 %v718_v7, %v211_v37  ;;  %v796_v20 = vadd.f32 %v795_v39, %v247_v47  ;;  %v259_v2 = vld [vmem:[%s3176_s0 + $0x7a0] sm:$0xff] }
  0xbb   :  { %v566_v23 = vadd.f32 %v565_v26, %v564_v6  ;;  %v642_v24 = vadd.f32 %v641_v59, %v175_v58  ;;  %v873_v61 = vadd.f32 %v872_v17, %v283_v60  ;;  %v877_v62 = vsel %vm356_vm0, %v307_v28, 0.0  ;;  %v295_v31 = vld [vmem:[%s3176_s0 + $0x8c0] sm:$0xff]  ;;  %v325_v14 = vld [vmem:[%s3176_s0 + $0x9b0] sm:$0xff] }
  0xbc   :  { %v413_v46 = vrot.slane %v412_v22, 2  ;;  %v489_v27 = vrot.slane %v488_v1, 4  ;;  %v720_v33 = vadd.f32 %v719_v19, %v217_v57  ;;  %v797_v63 = vadd.f32 %v796_v20, %v253_v49  ;;  %v301_v55 = vld [vmem:[%s3176_s0 + $0x8f0] sm:$0xff]  ;;  %v331_v21 = vld [vmem:[%s3176_s0 + $0x9e0] sm:$0xff] }
  0xbd   :  { %v567_v3 = vrot.slane %v566_v23, 4  ;;  %v644_v8 = vadd.f32 %v643_v32, %v642_v24  ;;  %v874_v25 = vadd.f32 %v873_v61, %v289_v12  ;;  %v950_v26 = vadd.f32 %v319_v45, %v313_v13  ;;  %v337_v32 = vld [vmem:[%s3176_s0 + $0xa10] sm:$0xff]  ;;  %v343_v40 = vld [vmem:[%s3176_s0 + $0xa40] sm:$0xff] }
  0xbe   :  { %v414_v36 = vadd.f32 %v413_v46, %v412_v22  ;;  %v490_v38 = vadd.f32 %v489_v27, %v488_v1  ;;  %v722_v34 = vadd.f32 %v721_v50, %v720_v33  ;;  %v798_v29 = vadd.f32 %v797_v63, %v259_v2  ;;  %v349_v10 = vld [vmem:[%s3176_s0 + $0xa70] sm:$0x1] }
  0xbf   :  { %v568_v53 = vadd.f32 %v567_v3, %v566_v23  ;;  %v645_v18 = vrot.slane %v644_v8, 4  ;;  %v875_v42 = vadd.f32 %v874_v25, %v295_v31  ;;  %v951_v41 = vadd.f32 %v950_v26, %v325_v14 }
  0xc0   :  { %v415_v43 = vrot.slane %v414_v36, 1  ;;  %v491_v30 = vrot.slane %v490_v38, 2  ;;  %v723_v35 = vrot.slane %v722_v34, 4  ;;  %v800_v48 = vadd.f32 %v799_v44, %v798_v29 }
  0xc1   :  { %v569_v16 = vrot.slane %v568_v53, 2  ;;  %v646_v4 = vadd.f32 %v645_v18, %v644_v8  ;;  %v876_v50 = vadd.f32 %v875_v42, %v301_v55  ;;  %v952_v5 = vadd.f32 %v951_v41, %v331_v21 }
  0xc2   :  { %v416_v15 = vadd.f32 %v415_v43, %v414_v36  ;;  %v492_v52 = vadd.f32 %v491_v30, %v490_v38  ;;  %v724_v54 = vadd.f32 %v723_v35, %v722_v34  ;;  %v801_v37 = vrot.slane %v800_v48, 4 }
  0xc3   :  { %v570_v47 = vadd.f32 %v569_v16, %v568_v53  ;;  %v647_v11 = vrot.slane %v646_v4, 2  ;;  %v878_v56 = vadd.f32 %v877_v62, %v876_v50  ;;  %v953_v44 = vadd.f32 %v952_v5, %v337_v32  ;;  %v1407_v53 = vld [vmem:[%s3178_s2] ss:$0 sm:$0xff] }
  0xc4   :  { %v493_v58 = vrot.slane %v492_v52, 1  ;;  %v725_v60 = vrot.slane %v724_v54, 2  ;;  %v802_v28 = vadd.f32 %v801_v37, %v800_v48  ;;  %v955_v0 = vsel %vm356_vm0, %v349_v10, 0.0 }
  0xc5   :  { %v571_v51 = vrot.slane %v570_v47, 1  ;;  %v648_v7 = vadd.f32 %v647_v11, %v646_v4  ;;  %v879_v39 = vrot.slane %v878_v56, 4  ;;  %v954_v9 = vadd.f32 %v953_v44, %v343_v40 }
  0xc6   :  { %v494_v57 = vadd.f32 %v493_v58, %v492_v52  ;;  %v726_v49 = vadd.f32 %v725_v60, %v724_v54  ;;  %v803_v6 = vrot.slane %v802_v28, 2 }
  0xc7   :  { %v572_v59 = vadd.f32 %v571_v51, %v570_v47  ;;  %v649_v17 = vrot.slane %v648_v7, 1  ;;  %v880_v12 = vadd.f32 %v879_v39, %v878_v56  ;;  %v956_v13 = vadd.f32 %v955_v0, %v954_v9 }
  0xc8   :  { %v727_v45 = vrot.slane %v726_v49, 1  ;;  %v804_v22 = vadd.f32 %v803_v6, %v802_v28  ;;  %v1162_v1 = vsel %vm1127_vm1, %v494_v57, %v416_v15 }
  0xc9   :  { %v650_v19 = vadd.f32 %v649_v17, %v648_v7  ;;  %v881_v20 = vrot.slane %v880_v12, 2  ;;  %v957_v2 = vrot.slane %v956_v13, 4  ;;  %v1163_v23 = vsel %vm1129_vm2, %v572_v59, %v1162_v1 }
  0xca   :  { %v728_v24 = vadd.f32 %v727_v45, %v726_v49  ;;  %v805_v61 = vrot.slane %v804_v22, 1 }
  0xcb   :  { %v882_v62 = vadd.f32 %v881_v20, %v880_v12  ;;  %v958_v31 = vadd.f32 %v957_v2, %v956_v13  ;;  %v1164_v14 = vsel %vm1131_vm3, %v650_v19, %v1163_v23 }
  0xcc   :  { %v806_v46 = vadd.f32 %v805_v61, %v804_v22  ;;  %v1165_v27 = vsel %vm1133_vm4, %v728_v24, %v1164_v14 }
  0xcd   :  { %v883_v33 = vrot.slane %v882_v62, 1  ;;  %v959_v63 = vrot.slane %v958_v31, 2 }
  0xce   :  { %v1166_v25 = vsel %vm1135_vm5, %v806_v46, %v1165_v27 }
  0xcf   :  { %v884_v3 = vadd.f32 %v883_v33, %v882_v62  ;;  %v960_v8 = vadd.f32 %v959_v63, %v958_v31 }
  0xd1   :  { %v961_v26 = vrot.slane %v960_v8, 1  ;;  %v1167_v55 = vsel %vm1137_vm6, %v884_v3, %v1166_v25 }
  0xd3   :  { %v962_v21 = vadd.f32 %v961_v26, %v960_v8 }
  0xd5   :  { %v1168_v36 = vsel %vm1139_vm7, %v962_v21, %v1167_v55 }
  0xd6   :  { %1387 = vmatmul.mubr.f32.vlgmr.msra.gmra.mrb[2].mxu0 %v1168_v36 }
 0x133   :  { %v1440_v38 = vpop.f32.mrb[0].mxu0 }
 0x134   :  { %v1441_v34 = vpop.f32.mrb[1].mxu0 }
 0x135   :  { %v1442_v29 = vadd.f32 %v1441_v34, %v1440_v38 }
 0x137   :  { %v1249_v18 = vadd.f32 %v1442_v29, %v1407_v53 }
 0x16d   :  { %v1475_v42 = vpop.f32.mrb[0].mxu1 }
 0x16e   :  { %v1476_v41 = vpop.f32.mrb[1].mxu1 }
 0x16f   :  { %v1477_v32 = vadd.f32 %v1476_v41, %v1475_v42 }
 0x171   :  { %v1319_v43 = vadd.f32 %v1477_v32, %v1249_v18 }
 0x1a9   :  { %v1510_v30 = vpop.f32.mrb[2].mxu0 }
 0x1aa   :  { %v1511_v35 = vpop.f32.mrb[3].mxu0 }
 0x1ab   :  { %v1512_v48 = vadd.f32 %v1511_v35, %v1510_v30 }
 0x1ad   :  { %v1389_v10 = vadd.f32 %v1512_v48, %v1319_v43 }
 0x1af   :  { %1392 = vst [vmem:[#allocation2] sm:$0xff] %v1389_v10 }
 0x1b0   :  { %1621 = shalt.err (!%p1618_p4)
}
 0x1b1   :  { %s1622_s8 = scalar_lea.hbm %s3179_s3, 128 }
 0x1b2   :  { %p1623_p5 = scmp.ne.s32.totalorder %s3179_s3, %s1622_s8  ;;  %p1626_p6 = scmp.lt.u32.totalorder %s1622_s8, %s3179_s3 }
 0x1b4   :  { %p1628_p7 = pnand %p1626_p6, %p1623_p5 }
 0x1b6   :  { %1631 = shalt.err (!%p1628_p7)
}
 0x1b7   :  { %1402 = dma.vmem_to_hbm [thread:$0]  %s1400_s6, 128, %s3179_s3, [#allocation3]  }
 0x1b8   :  { %1632 = dma.done.wait [#allocation3], 128  }
 0x1b9   :  { %1633 = vsyncadd [#allocation3], 4294967168 }
 0x1ba   :  { %1406 = vsyncpa [#allocation3], 1 }

</bundles_post_ra>
